<compile_context>
chip_gen: v6e
topology: v6e:2x2x1
jax: 0.10.0
libtpu: 0.0.40
codegen_flags: <defaults>
</compile_context>

<pallas_src>
import functools

import jax
import jax.numpy as jnp
from jax.experimental import pallas as pl
from jax.experimental.pallas import tpu as pltpu


# ------------------------------------------------------------------ fused LSTM-VAE forward kernel
def _lstm_vae_kernel(*refs, T, Bt, F, H, L, layers, activation):
    """One grid step = one batch tile (Bt rows, multiple of 8) through the whole VAE.

    Ref order:
      inputs : x(T,Bt,F), eps(T,Bt,L),
               [enc layer: w_ih(Din,4H) bf16, w_hh(H,4H) f32, b(1,4H) f32] * layers,
               w_heads(H,2L) bf16, b_heads(1,2L) f32,
               [dec layer: w_ih(Din,4H) bf16, w_hh(H,4H) f32, b(1,4H) f32] * layers,
               w_dd(H,F) bf16, b_dd(1,F) f32
      outputs: out slab (T,Bt,F+3L) laid out [recon | z | mu | logvar]
    """
    it = iter(refs)
    x_ref = next(it)
    eps_ref = next(it)
    enc = [(next(it), next(it), next(it)) for _ in range(layers)]
    wh_ref = next(it)
    bh_ref = next(it)
    dec = [(next(it), next(it), next(it)) for _ in range(layers)]
    wdd_ref = next(it)
    bdd_ref = next(it)
    out_ref = next(it)

    def run_lstm_stack(src, layer_refs):
        """src: (T*Bt, Din) f32 value; returns last layer's hidden sequence (T*Bt, H)."""
        for (wih_ref, whh_ref, b_ref) in layer_refs:
            # Hoisted input projection for all timesteps: one bf16 (T*Bt,Din)@(Din,4H) matmul,
            # f32 accumulate, bias folded in.
            pre = (jnp.dot(src.astype(jnp.bfloat16), wih_ref[...],
                           preferred_element_type=jnp.float32) + b_ref[...])
            # W_hh kept resident in vregs across the unrolled loop: only 4 vregs at H=32.
            # TODO(synk): for H >= 128 pin the RHS via pltpu.matmul_push_rhs/_acc_lhs/_pop (or
            # index whh_ref inside the dot) so the unrolled recurrence does not spill.
            whh = whh_ref[...]
            h = jnp.zeros((Bt, H), jnp.float32)
            c = jnp.zeros((Bt, H), jnp.float32)
            hs = []
            # TODO(synk): switch to lax.fori_loop with a small unroll factor once T grows.
            for t in range(T):
                g = pre[t * Bt:(t + 1) * Bt, :] + jnp.dot(
                    h, whh, preferred_element_type=jnp.float32)          # (Bt, 4H) lane-full
                # One lane-full sigmoid over the whole 4H gate vreg (EUP is otherwise idle)
                # instead of three quarter-width sigmoids; only the cell candidate needs tanh.
                sg = jax.nn.sigmoid(g)
                i_g = sg[:, 0 * H:1 * H]
                f_g = sg[:, 1 * H:2 * H]
                o_g = sg[:, 3 * H:4 * H]
                g_g = jnp.tanh(g[:, 2 * H:3 * H])
                c = f_g * c + i_g * g_g
                h = o_g * jnp.tanh(c)
                hs.append(h)                                             # stays in vregs
            # Single sublane-aligned concat instead of T masked scratch stores + reloads.
            src = jnp.concatenate(hs, axis=0)                            # (T*Bt, H)
        return src

    # --- encoder LSTM stack ---
    x = x_ref[...].reshape(T * Bt, F)
    h_all = run_lstm_stack(x, enc)

    # --- fused mu/logvar head + uniform reparameterization (torch.rand_like semantics) ---
    heads = (jnp.dot(h_all.astype(jnp.bfloat16), wh_ref[...],
                     preferred_element_type=jnp.float32) + bh_ref[...])
    mu = heads[:, 0:L]
    lv = heads[:, L:2 * L]
    eps = eps_ref[...].reshape(T * Bt, L)
    z = mu + eps * jnp.exp(0.5 * lv)

    # --- decoder LSTM stack (z stays in vregs; no HBM round trip) ---
    d_all = run_lstm_stack(z, dec)

    # --- decoder dense head (+ optional activation) ---
    recon = (jnp.dot(d_all.astype(jnp.bfloat16), wdd_ref[...],
                     preferred_element_type=jnp.float32) + bdd_ref[...])
    if activation == "sigmoid":
        recon = jax.nn.sigmoid(recon)
    elif activation == "neghalfone":
        recon = 1.5 * jax.nn.sigmoid(recon) - 0.5

    # Single lane-packed output slab: one store + one writeback DMA instead of four.
    slab = jnp.concatenate([recon, z, mu, lv], axis=-1)                  # (T*Bt, F+3L)
    out_ref[...] = slab.reshape(T, Bt, F + 3 * L)


# -------------------------------------------------------------------------------- wrapper / call
def _pick_batch_tile(B, T, F, H, L):
    """Largest sublane-aligned batch tile whose per-tile f32 working set stays within ~8 MiB.

    The budget is deliberately conservative so it also fits v7x (64 MiB physical / 32 MiB scoped
    VMEM -- half of v5e/v6e) while leaving double-buffering headroom for the auto-pipeline.
    """
    per_row = 4 * T * (F + L + 4 * H + 2 * H + (F + 3 * L)) * 2    # f32 + double-buffer slack
    budget = 8 * 1024 * 1024
    tile = (budget // max(per_row, 1)) // 8 * 8
    tile = max(8, min(tile, 256))
    tile = min(tile, ((B + 7) // 8) * 8)      # never pad the grid beyond the real batch
    return tile


@functools.partial(jax.jit, static_argnames=("sig", "negone"))
def lstm_vae_forward(params, x, eps, *, sig=False, negone=False):
    """x: (B, T, F) with F == seq_len; eps: (B, T, L) ~ U[0,1) (torch.rand_like semantics).

    Returns (recon, z, mu, logvar), all batch_first, matching PyTorch LSTMVAE.forward.
    """
    B, T, F = x.shape
    H = params["enc_lstm"][0][1].shape[0]
    L = params["mu_logvar"][0].shape[1] // 2
    layers = len(params["enc_lstm"])
    act = "sigmoid" if sig else ("neghalfone" if negone else None)

    Bt = _pick_batch_tile(B, T, F, H, L)
    B_pad = ((B + Bt - 1) // Bt) * Bt
    grid = (B_pad // Bt,)

    def to_time_major(a):                      # (B, T, feat) -> (T, B_pad, feat) f32
        a = jnp.transpose(a.astype(jnp.float32), (1, 0, 2))
        if B_pad != B:
            a = jnp.pad(a, ((0, 0), (0, B_pad - B), (0, 0)))
        return a

    x_tm = to_time_major(x)
    eps_tm = to_time_major(eps)

    inputs = [x_tm, eps_tm]
    for (wih, whh, b) in params["enc_lstm"]:
        inputs += [wih, whh, b]
    inputs += list(params["mu_logvar"])
    for (wih, whh, b) in params["dec_lstm"]:
        inputs += [wih, whh, b]
    inputs += list(params["dec_dense"])

    def weight_spec(arr):
        idx = (0,) * arr.ndim                  # same block every grid step -> fetched once
        return pl.BlockSpec(arr.shape, lambda b, _idx=idx: _idx)

    in_specs = [
        pl.BlockSpec((T, Bt, F), lambda b: (0, b, 0)),
        pl.BlockSpec((T, Bt, L), lambda b: (0, b, 0)),
    ] + [weight_spec(w) for w in inputs[2:]]

    W = F + 3 * L
    out_spec = pl.BlockSpec((T, Bt, W), lambda b: (0, b, 0))

    kernel = functools.partial(_lstm_vae_kernel, T=T, Bt=Bt, F=F, H=H, L=L,
                               layers=layers, activation=act)

    out = pl.pallas_call(
        kernel,
        grid=grid,
        in_specs=in_specs,
        out_specs=out_spec,
        out_shape=jax.ShapeDtypeStruct((T, B_pad, W), jnp.float32),
        compiler_params=pltpu.CompilerParams(
            dimension_semantics=("parallel",),       # megacore: batch tiles split across TCs
            vmem_limit_bytes=32 * 1024 * 1024,
        ),
    )(*inputs)

    out = jnp.transpose(out[:, :B, :], (1, 0, 2))    # (B, T, F+3L)
    recon = out[..., :F]
    z = out[..., F:F + L]
    mu = out[..., F + L:F + 2 * L]
    logvar = out[..., F + 2 * L:]
    return recon, z, mu, logvar


# ----------------------------------------------------------------------------- parameter init
def _init_lstm_stack(key, input_dim, hidden_dim, layers):
    """Deterministic U(-1/sqrt(H), 1/sqrt(H)) init, matching nn.LSTM's default scheme."""
    params = []
    k = 1.0 / float(hidden_dim) ** 0.5
    for l in range(layers):
        din = input_dim if l == 0 else hidden_dim
        key, k1, k2, k3, k4 = jax.random.split(key, 5)
        w_ih = jax.random.uniform(k1, (4 * hidden_dim, din), minval=-k, maxval=k)
        w_hh = jax.random.uniform(k2, (4 * hidden_dim, hidden_dim), minval=-k, maxval=k)
        b_ih = jax.random.uniform(k3, (4 * hidden_dim,), minval=-k, maxval=k)
        b_hh = jax.random.uniform(k4, (4 * hidden_dim,), minval=-k, maxval=k)
        params.append((jnp.asarray(w_ih.T, jnp.bfloat16),            # hoisted projection: bf16
                       jnp.asarray(w_hh.T, jnp.float32),             # recurrence: f32
                       jnp.asarray((b_ih + b_hh).reshape(1, -1), jnp.float32)))
    return params, key


def _init_linear(key, in_dim, out_dim):
    k = 1.0 / float(in_dim) ** 0.5
    key, k1, k2 = jax.random.split(key, 3)
    w = jax.random.uniform(k1, (out_dim, in_dim), minval=-k, maxval=k)
    b = jax.random.uniform(k2, (out_dim,), minval=-k, maxval=k)
    return (jnp.asarray(w.T, jnp.bfloat16), jnp.asarray(b.reshape(1, -1), jnp.float32)), key


def make_lstm_vae_params(key, seq_len, hidden_dim, latent_dim, layers):
    enc, key = _init_lstm_stack(key, seq_len, hidden_dim, layers)
    (mu_w, mu_b), key = _init_linear(key, hidden_dim, latent_dim)
    (lv_w, lv_b), key = _init_linear(key, hidden_dim, latent_dim)
    # Fuse the mu / logvar heads into one (H, 2L) matmul: cols [0:L] = mu, [L:2L] = logvar.
    heads = (jnp.concatenate([mu_w, lv_w], axis=1),
             jnp.concatenate([mu_b, lv_b], axis=1))
    dec, key = _init_lstm_stack(key, latent_dim, hidden_dim, layers)
    dd, key = _init_linear(key, hidden_dim, seq_len)
    return dict(enc_lstm=enc, mu_logvar=heads, dec_lstm=dec, dec_dense=dd)


# ----------------------------------------------------------------------------- pure-JAX reference
def _reference_forward(params, x, eps, *, sig=False, negone=False):
    B, T, _ = x.shape

    def lstm_stack(seq, stack):                    # seq: (B, T, Din)
        out = seq
        for (wih, whh, b) in stack:
            H = whh.shape[0]
            wih = wih.astype(jnp.float32)
            h = jnp.zeros((B, H), jnp.float32)
            c = jnp.zeros((B, H), jnp.float32)
            hs = []
            for t in range(T):
                gates = out[:, t, :] @ wih + h @ whh + b
                i = jax.nn.sigmoid(gates[:, 0 * H:1 * H])
                f = jax.nn.sigmoid(gates[:, 1 * H:2 * H])
                g = jnp.tanh(gates[:, 2 * H:3 * H])
                o = jax.nn.sigmoid(gates[:, 3 * H:4 * H])
                c = f * c + i * g
                h = o * jnp.tanh(c)
                hs.append(h)
            out = jnp.stack(hs, axis=1)            # (B, T, H)
        return out

    h = lstm_stack(x.astype(jnp.float32), params["enc_lstm"])
    wh, bh = params["mu_logvar"]
    heads = h @ wh.astype(jnp.float32) + bh
    L = heads.shape[-1] // 2
    mu, lv = heads[..., :L], heads[..., L:]
    z = mu + eps * jnp.exp(0.5 * lv)
    d = lstm_stack(z, params["dec_lstm"])
    wd, bd = params["dec_dense"]
    recon = d @ wd.astype(jnp.float32) + bd
    if sig:
        recon = jax.nn.sigmoid(recon)
    elif negone:
        recon = 1.5 * jax.nn.sigmoid(recon) - 0.5
    return recon, z, mu, lv


# ------------------------------------------------------------------------------------------ main
if __name__ == "__main__":
    B, T = 2, 8            # batch, number of time steps
    SEQ_LEN = 16           # LSTM feature dim (the PyTorch module names it seq_len)
    HIDDEN = 32
    LATENT = 8
    LAYERS = 1

    key = jax.random.PRNGKey(0)
    key, pkey, xkey, ekey = jax.random.split(key, 4)
    params = make_lstm_vae_params(pkey, SEQ_LEN, HIDDEN, LATENT, LAYERS)
    x = jax.random.normal(xkey, (B, T, SEQ_LEN), dtype=jnp.float32)
    # torch.rand_like(std) -> uniform [0, 1), generated host-side and shared with the kernel.
    eps = jax.random.uniform(ekey, (B, T, LATENT), dtype=jnp.float32)

    recon, z, mu, logvar = lstm_vae_forward(params, x, eps, sig=False, negone=False)
    jax.block_until_ready((recon, z, mu, logvar))

    assert recon.shape == (B, T, SEQ_LEN)
    assert z.shape == (B, T, LATENT)
    assert mu.shape == (B, T, LATENT)
    assert logvar.shape == (B, T, LATENT)

    # Correctness check vs. a pure-JAX reference (tolerance allows bf16 activation rounding on
    # the feed-forward matmuls; weights are shared so the dominant rounding is common-mode).
    r_ref, z_ref, mu_ref, lv_ref = _reference_forward(params, x, eps, sig=False, negone=False)
    for got, want, name in ((recon, r_ref, "recon"), (z, z_ref, "z"),
                            (mu, mu_ref, "mu"), (logvar, lv_ref, "logvar")):
        assert bool(jnp.allclose(got, want, atol=2e-2, rtol=2e-2)), f"mismatch in {name}"

    print("KERNEL_OK")
</pallas_src>

<mosaic_0001>
module attributes {stable_mosaic.version = 11 : i64} {
  func.func @_lstm_vae_kernel(%arg0: i32, %arg1: memref<8x8x16xf32, #tpu.memory_space<vmem>>, %arg2: memref<8x8x8xf32, #tpu.memory_space<vmem>>, %arg3: memref<16x128xbf16, #tpu.memory_space<vmem>>, %arg4: memref<32x128xf32, #tpu.memory_space<vmem>>, %arg5: memref<1x128xf32, #tpu.memory_space<vmem>>, %arg6: memref<32x16xbf16, #tpu.memory_space<vmem>>, %arg7: memref<1x16xf32, #tpu.memory_space<vmem>>, %arg8: memref<8x128xbf16, #tpu.memory_space<vmem>>, %arg9: memref<32x128xf32, #tpu.memory_space<vmem>>, %arg10: memref<1x128xf32, #tpu.memory_space<vmem>>, %arg11: memref<32x16xbf16, #tpu.memory_space<vmem>>, %arg12: memref<1x16xf32, #tpu.memory_space<vmem>>, %arg13: memref<8x8x40xf32, #tpu.memory_space<vmem>>) attributes {dimension_semantics = [#tpu.dimension_semantics<parallel>], iteration_bounds = array<i64: 1>, scalar_prefetch = 0 : i64, scratch_operands = 0 : i64, tpu.core_type = #tpu.core_type<tc>, window_params = [{transform_indices = @transform_0, window_bounds = array<i64: 8, 8, 16>}, {transform_indices = @transform_1, window_bounds = array<i64: 8, 8, 8>}, {pipeline_mode = #tpu.pipeline_mode<synchronous>, transform_indices = @transform_2, window_bounds = array<i64: 16, 128>}, {pipeline_mode = #tpu.pipeline_mode<synchronous>, transform_indices = @transform_3, window_bounds = array<i64: 32, 128>}, {pipeline_mode = #tpu.pipeline_mode<synchronous>, transform_indices = @transform_4, window_bounds = array<i64: 1, 128>}, {pipeline_mode = #tpu.pipeline_mode<synchronous>, transform_indices = @transform_5, window_bounds = array<i64: 32, 16>}, {pipeline_mode = #tpu.pipeline_mode<synchronous>, transform_indices = @transform_6, window_bounds = array<i64: 1, 16>}, {pipeline_mode = #tpu.pipeline_mode<synchronous>, transform_indices = @transform_7, window_bounds = array<i64: 8, 128>}, {pipeline_mode = #tpu.pipeline_mode<synchronous>, transform_indices = @transform_8, window_bounds = array<i64: 32, 128>}, {pipeline_mode = #tpu.pipeline_mode<synchronous>, transform_indices = @transform_9, window_bounds = array<i64: 1, 128>}, {pipeline_mode = #tpu.pipeline_mode<synchronous>, transform_indices = @transform_10, window_bounds = array<i64: 32, 16>}, {pipeline_mode = #tpu.pipeline_mode<synchronous>, transform_indices = @transform_11, window_bounds = array<i64: 1, 16>}, {transform_indices = @transform_12, window_bounds = array<i64: 8, 8, 40>}]} {
    %c0 = arith.constant 0 : index
    %c0_0 = arith.constant 0 : index
    %c0_1 = arith.constant 0 : index
    %0 = vector.load %arg1[%c0, %c0_0, %c0_1] : memref<8x8x16xf32, #tpu.memory_space<vmem>>, vector<8x8x16xf32>
    %1 = vector.shape_cast %0 : vector<8x8x16xf32> to vector<64x16xf32>
    %2 = arith.truncf %1 : vector<64x16xf32> to vector<64x16xbf16>
    %c0_2 = arith.constant 0 : index
    %c0_3 = arith.constant 0 : index
    %3 = vector.load %arg3[%c0_2, %c0_3] : memref<16x128xbf16, #tpu.memory_space<vmem>>, vector<16x128xbf16>
    %cst = arith.constant dense<0.000000e+00> : vector<64x128xf32>
    %4 = tpu.matmul %2, %3, %cst {dimension_numbers = #tpu.dot_dimension_numbers<[1], [0], [0], [1], [0, 0, 1, 1], [], []>} : vector<64x16xbf16>, vector<16x128xbf16>, vector<64x128xf32> -> vector<64x128xf32>
    %c0_4 = arith.constant 0 : index
    %c0_5 = arith.constant 0 : index
    %5 = vector.load %arg5[%c0_4, %c0_5] : memref<1x128xf32, #tpu.memory_space<vmem>>, vector<1x128xf32>
    %6 = vector.broadcast %5 : vector<1x128xf32> to vector<64x128xf32>
    %7 = arith.addf %4, %6 : vector<64x128xf32>
    %c0_6 = arith.constant 0 : index
    %c0_7 = arith.constant 0 : index
    %8 = vector.load %arg4[%c0_6, %c0_7] : memref<32x128xf32, #tpu.memory_space<vmem>>, vector<32x128xf32>
    %cst_8 = arith.constant 0.000000e+00 : f32
    %9 = vector.broadcast %cst_8 : f32 to vector<8x32xf32>
    %cst_9 = arith.constant 0.000000e+00 : f32
    %10 = vector.broadcast %cst_9 : f32 to vector<8x32xf32>
    %11 = vector.extract_strided_slice %7 {offsets = [0, 0], sizes = [8, 128], strides = [1, 1]} : vector<64x128xf32> to vector<8x128xf32>
    %cst_10 = arith.constant dense<0.000000e+00> : vector<8x128xf32>
    %12 = tpu.matmul %9, %8, %cst_10 {dimension_numbers = #tpu.dot_dimension_numbers<[1], [0], [0], [1], [0, 0, 1, 1], [], []>} : vector<8x32xf32>, vector<32x128xf32>, vector<8x128xf32> -> vector<8x128xf32>
    %13 = arith.addf %11, %12 : vector<8x128xf32>
    %14 = arith.negf %13 : vector<8x128xf32>
    %15 = math.exp %14 : vector<8x128xf32>
    %cst_11 = arith.constant 1.000000e+00 : f32
    %16 = vector.broadcast %cst_11 : f32 to vector<8x128xf32>
    %17 = arith.addf %16, %15 : vector<8x128xf32>
    %18 = arith.divf %16, %17 : vector<8x128xf32>
    %19 = vector.extract_strided_slice %18 {offsets = [0, 0], sizes = [8, 32], strides = [1, 1]} : vector<8x128xf32> to vector<8x32xf32>
    %20 = vector.extract_strided_slice %18 {offsets = [0, 32], sizes = [8, 32], strides = [1, 1]} : vector<8x128xf32> to vector<8x32xf32>
    %21 = vector.extract_strided_slice %18 {offsets = [0, 96], sizes = [8, 32], strides = [1, 1]} : vector<8x128xf32> to vector<8x32xf32>
    %22 = vector.extract_strided_slice %13 {offsets = [0, 64], sizes = [8, 32], strides = [1, 1]} : vector<8x128xf32> to vector<8x32xf32>
    %23 = math.tanh %22 : vector<8x32xf32>
    %24 = arith.mulf %20, %10 : vector<8x32xf32>
    %25 = arith.mulf %19, %23 : vector<8x32xf32>
    %26 = arith.addf %24, %25 : vector<8x32xf32>
    %27 = math.tanh %26 : vector<8x32xf32>
    %28 = arith.mulf %21, %27 : vector<8x32xf32>
    %29 = vector.extract_strided_slice %7 {offsets = [8, 0], sizes = [8, 128], strides = [1, 1]} : vector<64x128xf32> to vector<8x128xf32>
    %cst_12 = arith.constant dense<0.000000e+00> : vector<8x128xf32>
    %30 = tpu.matmul %28, %8, %cst_12 {dimension_numbers = #tpu.dot_dimension_numbers<[1], [0], [0], [1], [0, 0, 1, 1], [], []>} : vector<8x32xf32>, vector<32x128xf32>, vector<8x128xf32> -> vector<8x128xf32>
    %31 = arith.addf %29, %30 : vector<8x128xf32>
    %32 = arith.negf %31 : vector<8x128xf32>
    %33 = math.exp %32 : vector<8x128xf32>
    %cst_13 = arith.constant 1.000000e+00 : f32
    %34 = vector.broadcast %cst_13 : f32 to vector<8x128xf32>
    %35 = arith.addf %34, %33 : vector<8x128xf32>
    %36 = arith.divf %34, %35 : vector<8x128xf32>
    %37 = vector.extract_strided_slice %36 {offsets = [0, 0], sizes = [8, 32], strides = [1, 1]} : vector<8x128xf32> to vector<8x32xf32>
    %38 = vector.extract_strided_slice %36 {offsets = [0, 32], sizes = [8, 32], strides = [1, 1]} : vector<8x128xf32> to vector<8x32xf32>
    %39 = vector.extract_strided_slice %36 {offsets = [0, 96], sizes = [8, 32], strides = [1, 1]} : vector<8x128xf32> to vector<8x32xf32>
    %40 = vector.extract_strided_slice %31 {offsets = [0, 64], sizes = [8, 32], strides = [1, 1]} : vector<8x128xf32> to vector<8x32xf32>
    %41 = math.tanh %40 : vector<8x32xf32>
    %42 = arith.mulf %38, %26 : vector<8x32xf32>
    %43 = arith.mulf %37, %41 : vector<8x32xf32>
    %44 = arith.addf %42, %43 : vector<8x32xf32>
    %45 = math.tanh %44 : vector<8x32xf32>
    %46 = arith.mulf %39, %45 : vector<8x32xf32>
    %47 = vector.extract_strided_slice %7 {offsets = [16, 0], sizes = [8, 128], strides = [1, 1]} : vector<64x128xf32> to vector<8x128xf32>
    %cst_14 = arith.constant dense<0.000000e+00> : vector<8x128xf32>
    %48 = tpu.matmul %46, %8, %cst_14 {dimension_numbers = #tpu.dot_dimension_numbers<[1], [0], [0], [1], [0, 0, 1, 1], [], []>} : vector<8x32xf32>, vector<32x128xf32>, vector<8x128xf32> -> vector<8x128xf32>
    %49 = arith.addf %47, %48 : vector<8x128xf32>
    %50 = arith.negf %49 : vector<8x128xf32>
    %51 = math.exp %50 : vector<8x128xf32>
    %cst_15 = arith.constant 1.000000e+00 : f32
    %52 = vector.broadcast %cst_15 : f32 to vector<8x128xf32>
    %53 = arith.addf %52, %51 : vector<8x128xf32>
    %54 = arith.divf %52, %53 : vector<8x128xf32>
    %55 = vector.extract_strided_slice %54 {offsets = [0, 0], sizes = [8, 32], strides = [1, 1]} : vector<8x128xf32> to vector<8x32xf32>
    %56 = vector.extract_strided_slice %54 {offsets = [0, 32], sizes = [8, 32], strides = [1, 1]} : vector<8x128xf32> to vector<8x32xf32>
    %57 = vector.extract_strided_slice %54 {offsets = [0, 96], sizes = [8, 32], strides = [1, 1]} : vector<8x128xf32> to vector<8x32xf32>
    %58 = vector.extract_strided_slice %49 {offsets = [0, 64], sizes = [8, 32], strides = [1, 1]} : vector<8x128xf32> to vector<8x32xf32>
    %59 = math.tanh %58 : vector<8x32xf32>
    %60 = arith.mulf %56, %44 : vector<8x32xf32>
    %61 = arith.mulf %55, %59 : vector<8x32xf32>
    %62 = arith.addf %60, %61 : vector<8x32xf32>
    %63 = math.tanh %62 : vector<8x32xf32>
    %64 = arith.mulf %57, %63 : vector<8x32xf32>
    %65 = vector.extract_strided_slice %7 {offsets = [24, 0], sizes = [8, 128], strides = [1, 1]} : vector<64x128xf32> to vector<8x128xf32>
    %cst_16 = arith.constant dense<0.000000e+00> : vector<8x128xf32>
    %66 = tpu.matmul %64, %8, %cst_16 {dimension_numbers = #tpu.dot_dimension_numbers<[1], [0], [0], [1], [0, 0, 1, 1], [], []>} : vector<8x32xf32>, vector<32x128xf32>, vector<8x128xf32> -> vector<8x128xf32>
    %67 = arith.addf %65, %66 : vector<8x128xf32>
    %68 = arith.negf %67 : vector<8x128xf32>
    %69 = math.exp %68 : vector<8x128xf32>
    %cst_17 = arith.constant 1.000000e+00 : f32
    %70 = vector.broadcast %cst_17 : f32 to vector<8x128xf32>
    %71 = arith.addf %70, %69 : vector<8x128xf32>
    %72 = arith.divf %70, %71 : vector<8x128xf32>
    %73 = vector.extract_strided_slice %72 {offsets = [0, 0], sizes = [8, 32], strides = [1, 1]} : vector<8x128xf32> to vector<8x32xf32>
    %74 = vector.extract_strided_slice %72 {offsets = [0, 32], sizes = [8, 32], strides = [1, 1]} : vector<8x128xf32> to vector<8x32xf32>
    %75 = vector.extract_strided_slice %72 {offsets = [0, 96], sizes = [8, 32], strides = [1, 1]} : vector<8x128xf32> to vector<8x32xf32>
    %76 = vector.extract_strided_slice %67 {offsets = [0, 64], sizes = [8, 32], strides = [1, 1]} : vector<8x128xf32> to vector<8x32xf32>
    %77 = math.tanh %76 : vector<8x32xf32>
    %78 = arith.mulf %74, %62 : vector<8x32xf32>
    %79 = arith.mulf %73, %77 : vector<8x32xf32>
    %80 = arith.addf %78, %79 : vector<8x32xf32>
    %81 = math.tanh %80 : vector<8x32xf32>
    %82 = arith.mulf %75, %81 : vector<8x32xf32>
    %83 = vector.extract_strided_slice %7 {offsets = [32, 0], sizes = [8, 128], strides = [1, 1]} : vector<64x128xf32> to vector<8x128xf32>
    %cst_18 = arith.constant dense<0.000000e+00> : vector<8x128xf32>
    %84 = tpu.matmul %82, %8, %cst_18 {dimension_numbers = #tpu.dot_dimension_numbers<[1], [0], [0], [1], [0, 0, 1, 1], [], []>} : vector<8x32xf32>, vector<32x128xf32>, vector<8x128xf32> -> vector<8x128xf32>
    %85 = arith.addf %83, %84 : vector<8x128xf32>
    %86 = arith.negf %85 : vector<8x128xf32>
    %87 = math.exp %86 : vector<8x128xf32>
    %cst_19 = arith.constant 1.000000e+00 : f32
    %88 = vector.broadcast %cst_19 : f32 to vector<8x128xf32>
    %89 = arith.addf %88, %87 : vector<8x128xf32>
    %90 = arith.divf %88, %89 : vector<8x128xf32>
    %91 = vector.extract_strided_slice %90 {offsets = [0, 0], sizes = [8, 32], strides = [1, 1]} : vector<8x128xf32> to vector<8x32xf32>
    %92 = vector.extract_strided_slice %90 {offsets = [0, 32], sizes = [8, 32], strides = [1, 1]} : vector<8x128xf32> to vector<8x32xf32>
    %93 = vector.extract_strided_slice %90 {offsets = [0, 96], sizes = [8, 32], strides = [1, 1]} : vector<8x128xf32> to vector<8x32xf32>
    %94 = vector.extract_strided_slice %85 {offsets = [0, 64], sizes = [8, 32], strides = [1, 1]} : vector<8x128xf32> to vector<8x32xf32>
    %95 = math.tanh %94 : vector<8x32xf32>
    %96 = arith.mulf %92, %80 : vector<8x32xf32>
    %97 = arith.mulf %91, %95 : vector<8x32xf32>
    %98 = arith.addf %96, %97 : vector<8x32xf32>
    %99 = math.tanh %98 : vector<8x32xf32>
    %100 = arith.mulf %93, %99 : vector<8x32xf32>
    %101 = vector.extract_strided_slice %7 {offsets = [40, 0], sizes = [8, 128], strides = [1, 1]} : vector<64x128xf32> to vector<8x128xf32>
    %cst_20 = arith.constant dense<0.000000e+00> : vector<8x128xf32>
    %102 = tpu.matmul %100, %8, %cst_20 {dimension_numbers = #tpu.dot_dimension_numbers<[1], [0], [0], [1], [0, 0, 1, 1], [], []>} : vector<8x32xf32>, vector<32x128xf32>, vector<8x128xf32> -> vector<8x128xf32>
    %103 = arith.addf %101, %102 : vector<8x128xf32>
    %104 = arith.negf %103 : vector<8x128xf32>
    %105 = math.exp %104 : vector<8x128xf32>
    %cst_21 = arith.constant 1.000000e+00 : f32
    %106 = vector.broadcast %cst_21 : f32 to vector<8x128xf32>
    %107 = arith.addf %106, %105 : vector<8x128xf32>
    %108 = arith.divf %106, %107 : vector<8x128xf32>
    %109 = vector.extract_strided_slice %108 {offsets = [0, 0], sizes = [8, 32], strides = [1, 1]} : vector<8x128xf32> to vector<8x32xf32>
    %110 = vector.extract_strided_slice %108 {offsets = [0, 32], sizes = [8, 32], strides = [1, 1]} : vector<8x128xf32> to vector<8x32xf32>
    %111 = vector.extract_strided_slice %108 {offsets = [0, 96], sizes = [8, 32], strides = [1, 1]} : vector<8x128xf32> to vector<8x32xf32>
    %112 = vector.extract_strided_slice %103 {offsets = [0, 64], sizes = [8, 32], strides = [1, 1]} : vector<8x128xf32> to vector<8x32xf32>
    %113 = math.tanh %112 : vector<8x32xf32>
    %114 = arith.mulf %110, %98 : vector<8x32xf32>
    %115 = arith.mulf %109, %113 : vector<8x32xf32>
    %116 = arith.addf %114, %115 : vector<8x32xf32>
    %117 = math.tanh %116 : vector<8x32xf32>
    %118 = arith.mulf %111, %117 : vector<8x32xf32>
    %119 = vector.extract_strided_slice %7 {offsets = [48, 0], sizes = [8, 128], strides = [1, 1]} : vector<64x128xf32> to vector<8x128xf32>
    %cst_22 = arith.constant dense<0.000000e+00> : vector<8x128xf32>
    %120 = tpu.matmul %118, %8, %cst_22 {dimension_numbers = #tpu.dot_dimension_numbers<[1], [0], [0], [1], [0, 0, 1, 1], [], []>} : vector<8x32xf32>, vector<32x128xf32>, vector<8x128xf32> -> vector<8x128xf32>
    %121 = arith.addf %119, %120 : vector<8x128xf32>
    %122 = arith.negf %121 : vector<8x128xf32>
    %123 = math.exp %122 : vector<8x128xf32>
    %cst_23 = arith.constant 1.000000e+00 : f32
    %124 = vector.broadcast %cst_23 : f32 to vector<8x128xf32>
    %125 = arith.addf %124, %123 : vector<8x128xf32>
    %126 = arith.divf %124, %125 : vector<8x128xf32>
    %127 = vector.extract_strided_slice %126 {offsets = [0, 0], sizes = [8, 32], strides = [1, 1]} : vector<8x128xf32> to vector<8x32xf32>
    %128 = vector.extract_strided_slice %126 {offsets = [0, 32], sizes = [8, 32], strides = [1, 1]} : vector<8x128xf32> to vector<8x32xf32>
    %129 = vector.extract_strided_slice %126 {offsets = [0, 96], sizes = [8, 32], strides = [1, 1]} : vector<8x128xf32> to vector<8x32xf32>
    %130 = vector.extract_strided_slice %121 {offsets = [0, 64], sizes = [8, 32], strides = [1, 1]} : vector<8x128xf32> to vector<8x32xf32>
    %131 = math.tanh %130 : vector<8x32xf32>
    %132 = arith.mulf %128, %116 : vector<8x32xf32>
    %133 = arith.mulf %127, %131 : vector<8x32xf32>
    %134 = arith.addf %132, %133 : vector<8x32xf32>
    %135 = math.tanh %134 : vector<8x32xf32>
    %136 = arith.mulf %129, %135 : vector<8x32xf32>
    %137 = vector.extract_strided_slice %7 {offsets = [56, 0], sizes = [8, 128], strides = [1, 1]} : vector<64x128xf32> to vector<8x128xf32>
    %cst_24 = arith.constant dense<0.000000e+00> : vector<8x128xf32>
    %138 = tpu.matmul %136, %8, %cst_24 {dimension_numbers = #tpu.dot_dimension_numbers<[1], [0], [0], [1], [0, 0, 1, 1], [], []>} : vector<8x32xf32>, vector<32x128xf32>, vector<8x128xf32> -> vector<8x128xf32>
    %139 = arith.addf %137, %138 : vector<8x128xf32>
    %140 = arith.negf %139 : vector<8x128xf32>
    %141 = math.exp %140 : vector<8x128xf32>
    %cst_25 = arith.constant 1.000000e+00 : f32
    %142 = vector.broadcast %cst_25 : f32 to vector<8x128xf32>
    %143 = arith.addf %142, %141 : vector<8x128xf32>
    %144 = arith.divf %142, %143 : vector<8x128xf32>
    %145 = vector.extract_strided_slice %144 {offsets = [0, 0], sizes = [8, 32], strides = [1, 1]} : vector<8x128xf32> to vector<8x32xf32>
    %146 = vector.extract_strided_slice %144 {offsets = [0, 32], sizes = [8, 32], strides = [1, 1]} : vector<8x128xf32> to vector<8x32xf32>
    %147 = vector.extract_strided_slice %144 {offsets = [0, 96], sizes = [8, 32], strides = [1, 1]} : vector<8x128xf32> to vector<8x32xf32>
    %148 = vector.extract_strided_slice %139 {offsets = [0, 64], sizes = [8, 32], strides = [1, 1]} : vector<8x128xf32> to vector<8x32xf32>
    %149 = math.tanh %148 : vector<8x32xf32>
    %150 = arith.mulf %146, %134 : vector<8x32xf32>
    %151 = arith.mulf %145, %149 : vector<8x32xf32>
    %152 = arith.addf %150, %151 : vector<8x32xf32>
    %153 = math.tanh %152 : vector<8x32xf32>
    %154 = arith.mulf %147, %153 : vector<8x32xf32>
    %155 = tpu.concatenate %28, %46, %64, %82, %100, %118, %136, %154 in 0 : vector<8x32xf32>, vector<8x32xf32>, vector<8x32xf32>, vector<8x32xf32>, vector<8x32xf32>, vector<8x32xf32>, vector<8x32xf32>, vector<8x32xf32> -> vector<64x32xf32>
    %156 = arith.truncf %155 : vector<64x32xf32> to vector<64x32xbf16>
    %c0_26 = arith.constant 0 : index
    %c0_27 = arith.constant 0 : index
    %157 = vector.load %arg6[%c0_26, %c0_27] : memref<32x16xbf16, #tpu.memory_space<vmem>>, vector<32x16xbf16>
    %cst_28 = arith.constant dense<0.000000e+00> : vector<64x16xf32>
    %158 = tpu.matmul %156, %157, %cst_28 {dimension_numbers = #tpu.dot_dimension_numbers<[1], [0], [0], [1], [0, 0, 1, 1], [], []>} : vector<64x32xbf16>, vector<32x16xbf16>, vector<64x16xf32> -> vector<64x16xf32>
    %c0_29 = arith.constant 0 : index
    %c0_30 = arith.constant 0 : index
    %159 = vector.load %arg7[%c0_29, %c0_30] : memref<1x16xf32, #tpu.memory_space<vmem>>, vector<1x16xf32>
    %160 = vector.broadcast %159 : vector<1x16xf32> to vector<64x16xf32>
    %161 = arith.addf %158, %160 : vector<64x16xf32>
    %162 = vector.extract_strided_slice %161 {offsets = [0, 0], sizes = [64, 8], strides = [1, 1]} : vector<64x16xf32> to vector<64x8xf32>
    %163 = vector.extract_strided_slice %161 {offsets = [0, 8], sizes = [64, 8], strides = [1, 1]} : vector<64x16xf32> to vector<64x8xf32>
    %c0_31 = arith.constant 0 : index
    %c0_32 = arith.constant 0 : index
    %c0_33 = arith.constant 0 : index
    %164 = vector.load %arg2[%c0_31, %c0_32, %c0_33] : memref<8x8x8xf32, #tpu.memory_space<vmem>>, vector<8x8x8xf32>
    %165 = vector.shape_cast %164 : vector<8x8x8xf32> to vector<64x8xf32>
    %cst_34 = arith.constant 5.000000e-01 : f32
    %166 = vector.broadcast %cst_34 : f32 to vector<64x8xf32>
    %167 = arith.mulf %166, %163 : vector<64x8xf32>
    %168 = math.exp %167 : vector<64x8xf32>
    %169 = arith.mulf %165, %168 : vector<64x8xf32>
    %170 = arith.addf %162, %169 : vector<64x8xf32>
    %171 = arith.truncf %170 : vector<64x8xf32> to vector<64x8xbf16>
    %c0_35 = arith.constant 0 : index
    %c0_36 = arith.constant 0 : index
    %172 = vector.load %arg8[%c0_35, %c0_36] : memref<8x128xbf16, #tpu.memory_space<vmem>>, vector<8x128xbf16>
    %cst_37 = arith.constant dense<0.000000e+00> : vector<64x128xf32>
    %173 = tpu.matmul %171, %172, %cst_37 {dimension_numbers = #tpu.dot_dimension_numbers<[1], [0], [0], [1], [0, 0, 1, 1], [], []>} : vector<64x8xbf16>, vector<8x128xbf16>, vector<64x128xf32> -> vector<64x128xf32>
    %c0_38 = arith.constant 0 : index
    %c0_39 = arith.constant 0 : index
    %174 = vector.load %arg10[%c0_38, %c0_39] : memref<1x128xf32, #tpu.memory_space<vmem>>, vector<1x128xf32>
    %175 = vector.broadcast %174 : vector<1x128xf32> to vector<64x128xf32>
    %176 = arith.addf %173, %175 : vector<64x128xf32>
    %c0_40 = arith.constant 0 : index
    %c0_41 = arith.constant 0 : index
    %177 = vector.load %arg9[%c0_40, %c0_41] : memref<32x128xf32, #tpu.memory_space<vmem>>, vector<32x128xf32>
    %cst_42 = arith.constant 0.000000e+00 : f32
    %178 = vector.broadcast %cst_42 : f32 to vector<8x32xf32>
    %cst_43 = arith.constant 0.000000e+00 : f32
    %179 = vector.broadcast %cst_43 : f32 to vector<8x32xf32>
    %180 = vector.extract_strided_slice %176 {offsets = [0, 0], sizes = [8, 128], strides = [1, 1]} : vector<64x128xf32> to vector<8x128xf32>
    %cst_44 = arith.constant dense<0.000000e+00> : vector<8x128xf32>
    %181 = tpu.matmul %178, %177, %cst_44 {dimension_numbers = #tpu.dot_dimension_numbers<[1], [0], [0], [1], [0, 0, 1, 1], [], []>} : vector<8x32xf32>, vector<32x128xf32>, vector<8x128xf32> -> vector<8x128xf32>
    %182 = arith.addf %180, %181 : vector<8x128xf32>
    %183 = arith.negf %182 : vector<8x128xf32>
    %184 = math.exp %183 : vector<8x128xf32>
    %cst_45 = arith.constant 1.000000e+00 : f32
    %185 = vector.broadcast %cst_45 : f32 to vector<8x128xf32>
    %186 = arith.addf %185, %184 : vector<8x128xf32>
    %187 = arith.divf %185, %186 : vector<8x128xf32>
    %188 = vector.extract_strided_slice %187 {offsets = [0, 0], sizes = [8, 32], strides = [1, 1]} : vector<8x128xf32> to vector<8x32xf32>
    %189 = vector.extract_strided_slice %187 {offsets = [0, 32], sizes = [8, 32], strides = [1, 1]} : vector<8x128xf32> to vector<8x32xf32>
    %190 = vector.extract_strided_slice %187 {offsets = [0, 96], sizes = [8, 32], strides = [1, 1]} : vector<8x128xf32> to vector<8x32xf32>
    %191 = vector.extract_strided_slice %182 {offsets = [0, 64], sizes = [8, 32], strides = [1, 1]} : vector<8x128xf32> to vector<8x32xf32>
    %192 = math.tanh %191 : vector<8x32xf32>
    %193 = arith.mulf %189, %179 : vector<8x32xf32>
    %194 = arith.mulf %188, %192 : vector<8x32xf32>
    %195 = arith.addf %193, %194 : vector<8x32xf32>
    %196 = math.tanh %195 : vector<8x32xf32>
    %197 = arith.mulf %190, %196 : vector<8x32xf32>
    %198 = vector.extract_strided_slice %176 {offsets = [8, 0], sizes = [8, 128], strides = [1, 1]} : vector<64x128xf32> to vector<8x128xf32>
    %cst_46 = arith.constant dense<0.000000e+00> : vector<8x128xf32>
    %199 = tpu.matmul %197, %177, %cst_46 {dimension_numbers = #tpu.dot_dimension_numbers<[1], [0], [0], [1], [0, 0, 1, 1], [], []>} : vector<8x32xf32>, vector<32x128xf32>, vector<8x128xf32> -> vector<8x128xf32>
    %200 = arith.addf %198, %199 : vector<8x128xf32>
    %201 = arith.negf %200 : vector<8x128xf32>
    %202 = math.exp %201 : vector<8x128xf32>
    %cst_47 = arith.constant 1.000000e+00 : f32
    %203 = vector.broadcast %cst_47 : f32 to vector<8x128xf32>
    %204 = arith.addf %203, %202 : vector<8x128xf32>
    %205 = arith.divf %203, %204 : vector<8x128xf32>
    %206 = vector.extract_strided_slice %205 {offsets = [0, 0], sizes = [8, 32], strides = [1, 1]} : vector<8x128xf32> to vector<8x32xf32>
    %207 = vector.extract_strided_slice %205 {offsets = [0, 32], sizes = [8, 32], strides = [1, 1]} : vector<8x128xf32> to vector<8x32xf32>
    %208 = vector.extract_strided_slice %205 {offsets = [0, 96], sizes = [8, 32], strides = [1, 1]} : vector<8x128xf32> to vector<8x32xf32>
    %209 = vector.extract_strided_slice %200 {offsets = [0, 64], sizes = [8, 32], strides = [1, 1]} : vector<8x128xf32> to vector<8x32xf32>
    %210 = math.tanh %209 : vector<8x32xf32>
    %211 = arith.mulf %207, %195 : vector<8x32xf32>
    %212 = arith.mulf %206, %210 : vector<8x32xf32>
    %213 = arith.addf %211, %212 : vector<8x32xf32>
    %214 = math.tanh %213 : vector<8x32xf32>
    %215 = arith.mulf %208, %214 : vector<8x32xf32>
    %216 = vector.extract_strided_slice %176 {offsets = [16, 0], sizes = [8, 128], strides = [1, 1]} : vector<64x128xf32> to vector<8x128xf32>
    %cst_48 = arith.constant dense<0.000000e+00> : vector<8x128xf32>
    %217 = tpu.matmul %215, %177, %cst_48 {dimension_numbers = #tpu.dot_dimension_numbers<[1], [0], [0], [1], [0, 0, 1, 1], [], []>} : vector<8x32xf32>, vector<32x128xf32>, vector<8x128xf32> -> vector<8x128xf32>
    %218 = arith.addf %216, %217 : vector<8x128xf32>
    %219 = arith.negf %218 : vector<8x128xf32>
    %220 = math.exp %219 : vector<8x128xf32>
    %cst_49 = arith.constant 1.000000e+00 : f32
    %221 = vector.broadcast %cst_49 : f32 to vector<8x128xf32>
    %222 = arith.addf %221, %220 : vector<8x128xf32>
    %223 = arith.divf %221, %222 : vector<8x128xf32>
    %224 = vector.extract_strided_slice %223 {offsets = [0, 0], sizes = [8, 32], strides = [1, 1]} : vector<8x128xf32> to vector<8x32xf32>
    %225 = vector.extract_strided_slice %223 {offsets = [0, 32], sizes = [8, 32], strides = [1, 1]} : vector<8x128xf32> to vector<8x32xf32>
    %226 = vector.extract_strided_slice %223 {offsets = [0, 96], sizes = [8, 32], strides = [1, 1]} : vector<8x128xf32> to vector<8x32xf32>
    %227 = vector.extract_strided_slice %218 {offsets = [0, 64], sizes = [8, 32], strides = [1, 1]} : vector<8x128xf32> to vector<8x32xf32>
    %228 = math.tanh %227 : vector<8x32xf32>
    %229 = arith.mulf %225, %213 : vector<8x32xf32>
    %230 = arith.mulf %224, %228 : vector<8x32xf32>
    %231 = arith.addf %229, %230 : vector<8x32xf32>
    %232 = math.tanh %231 : vector<8x32xf32>
    %233 = arith.mulf %226, %232 : vector<8x32xf32>
    %234 = vector.extract_strided_slice %176 {offsets = [24, 0], sizes = [8, 128], strides = [1, 1]} : vector<64x128xf32> to vector<8x128xf32>
    %cst_50 = arith.constant dense<0.000000e+00> : vector<8x128xf32>
    %235 = tpu.matmul %233, %177, %cst_50 {dimension_numbers = #tpu.dot_dimension_numbers<[1], [0], [0], [1], [0, 0, 1, 1], [], []>} : vector<8x32xf32>, vector<32x128xf32>, vector<8x128xf32> -> vector<8x128xf32>
    %236 = arith.addf %234, %235 : vector<8x128xf32>
    %237 = arith.negf %236 : vector<8x128xf32>
    %238 = math.exp %237 : vector<8x128xf32>
    %cst_51 = arith.constant 1.000000e+00 : f32
    %239 = vector.broadcast %cst_51 : f32 to vector<8x128xf32>
    %240 = arith.addf %239, %238 : vector<8x128xf32>
    %241 = arith.divf %239, %240 : vector<8x128xf32>
    %242 = vector.extract_strided_slice %241 {offsets = [0, 0], sizes = [8, 32], strides = [1, 1]} : vector<8x128xf32> to vector<8x32xf32>
    %243 = vector.extract_strided_slice %241 {offsets = [0, 32], sizes = [8, 32], strides = [1, 1]} : vector<8x128xf32> to vector<8x32xf32>
    %244 = vector.extract_strided_slice %241 {offsets = [0, 96], sizes = [8, 32], strides = [1, 1]} : vector<8x128xf32> to vector<8x32xf32>
    %245 = vector.extract_strided_slice %236 {offsets = [0, 64], sizes = [8, 32], strides = [1, 1]} : vector<8x128xf32> to vector<8x32xf32>
    %246 = math.tanh %245 : vector<8x32xf32>
    %247 = arith.mulf %243, %231 : vector<8x32xf32>
    %248 = arith.mulf %242, %246 : vector<8x32xf32>
    %249 = arith.addf %247, %248 : vector<8x32xf32>
    %250 = math.tanh %249 : vector<8x32xf32>
    %251 = arith.mulf %244, %250 : vector<8x32xf32>
    %252 = vector.extract_strided_slice %176 {offsets = [32, 0], sizes = [8, 128], strides = [1, 1]} : vector<64x128xf32> to vector<8x128xf32>
    %cst_52 = arith.constant dense<0.000000e+00> : vector<8x128xf32>
    %253 = tpu.matmul %251, %177, %cst_52 {dimension_numbers = #tpu.dot_dimension_numbers<[1], [0], [0], [1], [0, 0, 1, 1], [], []>} : vector<8x32xf32>, vector<32x128xf32>, vector<8x128xf32> -> vector<8x128xf32>
    %254 = arith.addf %252, %253 : vector<8x128xf32>
    %255 = arith.negf %254 : vector<8x128xf32>
    %256 = math.exp %255 : vector<8x128xf32>
    %cst_53 = arith.constant 1.000000e+00 : f32
    %257 = vector.broadcast %cst_53 : f32 to vector<8x128xf32>
    %258 = arith.addf %257, %256 : vector<8x128xf32>
    %259 = arith.divf %257, %258 : vector<8x128xf32>
    %260 = vector.extract_strided_slice %259 {offsets = [0, 0], sizes = [8, 32], strides = [1, 1]} : vector<8x128xf32> to vector<8x32xf32>
    %261 = vector.extract_strided_slice %259 {offsets = [0, 32], sizes = [8, 32], strides = [1, 1]} : vector<8x128xf32> to vector<8x32xf32>
    %262 = vector.extract_strided_slice %259 {offsets = [0, 96], sizes = [8, 32], strides = [1, 1]} : vector<8x128xf32> to vector<8x32xf32>
    %263 = vector.extract_strided_slice %254 {offsets = [0, 64], sizes = [8, 32], strides = [1, 1]} : vector<8x128xf32> to vector<8x32xf32>
    %264 = math.tanh %263 : vector<8x32xf32>
    %265 = arith.mulf %261, %249 : vector<8x32xf32>
    %266 = arith.mulf %260, %264 : vector<8x32xf32>
    %267 = arith.addf %265, %266 : vector<8x32xf32>
    %268 = math.tanh %267 : vector<8x32xf32>
    %269 = arith.mulf %262, %268 : vector<8x32xf32>
    %270 = vector.extract_strided_slice %176 {offsets = [40, 0], sizes = [8, 128], strides = [1, 1]} : vector<64x128xf32> to vector<8x128xf32>
    %cst_54 = arith.constant dense<0.000000e+00> : vector<8x128xf32>
    %271 = tpu.matmul %269, %177, %cst_54 {dimension_numbers = #tpu.dot_dimension_numbers<[1], [0], [0], [1], [0, 0, 1, 1], [], []>} : vector<8x32xf32>, vector<32x128xf32>, vector<8x128xf32> -> vector<8x128xf32>
    %272 = arith.addf %270, %271 : vector<8x128xf32>
    %273 = arith.negf %272 : vector<8x128xf32>
    %274 = math.exp %273 : vector<8x128xf32>
    %cst_55 = arith.constant 1.000000e+00 : f32
    %275 = vector.broadcast %cst_55 : f32 to vector<8x128xf32>
    %276 = arith.addf %275, %274 : vector<8x128xf32>
    %277 = arith.divf %275, %276 : vector<8x128xf32>
    %278 = vector.extract_strided_slice %277 {offsets = [0, 0], sizes = [8, 32], strides = [1, 1]} : vector<8x128xf32> to vector<8x32xf32>
    %279 = vector.extract_strided_slice %277 {offsets = [0, 32], sizes = [8, 32], strides = [1, 1]} : vector<8x128xf32> to vector<8x32xf32>
    %280 = vector.extract_strided_slice %277 {offsets = [0, 96], sizes = [8, 32], strides = [1, 1]} : vector<8x128xf32> to vector<8x32xf32>
    %281 = vector.extract_strided_slice %272 {offsets = [0, 64], sizes = [8, 32], strides = [1, 1]} : vector<8x128xf32> to vector<8x32xf32>
    %282 = math.tanh %281 : vector<8x32xf32>
    %283 = arith.mulf %279, %267 : vector<8x32xf32>
    %284 = arith.mulf %278, %282 : vector<8x32xf32>
    %285 = arith.addf %283, %284 : vector<8x32xf32>
    %286 = math.tanh %285 : vector<8x32xf32>
    %287 = arith.mulf %280, %286 : vector<8x32xf32>
    %288 = vector.extract_strided_slice %176 {offsets = [48, 0], sizes = [8, 128], strides = [1, 1]} : vector<64x128xf32> to vector<8x128xf32>
    %cst_56 = arith.constant dense<0.000000e+00> : vector<8x128xf32>
    %289 = tpu.matmul %287, %177, %cst_56 {dimension_numbers = #tpu.dot_dimension_numbers<[1], [0], [0], [1], [0, 0, 1, 1], [], []>} : vector<8x32xf32>, vector<32x128xf32>, vector<8x128xf32> -> vector<8x128xf32>
    %290 = arith.addf %288, %289 : vector<8x128xf32>
    %291 = arith.negf %290 : vector<8x128xf32>
    %292 = math.exp %291 : vector<8x128xf32>
    %cst_57 = arith.constant 1.000000e+00 : f32
    %293 = vector.broadcast %cst_57 : f32 to vector<8x128xf32>
    %294 = arith.addf %293, %292 : vector<8x128xf32>
    %295 = arith.divf %293, %294 : vector<8x128xf32>
    %296 = vector.extract_strided_slice %295 {offsets = [0, 0], sizes = [8, 32], strides = [1, 1]} : vector<8x128xf32> to vector<8x32xf32>
    %297 = vector.extract_strided_slice %295 {offsets = [0, 32], sizes = [8, 32], strides = [1, 1]} : vector<8x128xf32> to vector<8x32xf32>
    %298 = vector.extract_strided_slice %295 {offsets = [0, 96], sizes = [8, 32], strides = [1, 1]} : vector<8x128xf32> to vector<8x32xf32>
    %299 = vector.extract_strided_slice %290 {offsets = [0, 64], sizes = [8, 32], strides = [1, 1]} : vector<8x128xf32> to vector<8x32xf32>
    %300 = math.tanh %299 : vector<8x32xf32>
    %301 = arith.mulf %297, %285 : vector<8x32xf32>
    %302 = arith.mulf %296, %300 : vector<8x32xf32>
    %303 = arith.addf %301, %302 : vector<8x32xf32>
    %304 = math.tanh %303 : vector<8x32xf32>
    %305 = arith.mulf %298, %304 : vector<8x32xf32>
    %306 = vector.extract_strided_slice %176 {offsets = [56, 0], sizes = [8, 128], strides = [1, 1]} : vector<64x128xf32> to vector<8x128xf32>
    %cst_58 = arith.constant dense<0.000000e+00> : vector<8x128xf32>
    %307 = tpu.matmul %305, %177, %cst_58 {dimension_numbers = #tpu.dot_dimension_numbers<[1], [0], [0], [1], [0, 0, 1, 1], [], []>} : vector<8x32xf32>, vector<32x128xf32>, vector<8x128xf32> -> vector<8x128xf32>
    %308 = arith.addf %306, %307 : vector<8x128xf32>
    %309 = arith.negf %308 : vector<8x128xf32>
    %310 = math.exp %309 : vector<8x128xf32>
    %cst_59 = arith.constant 1.000000e+00 : f32
    %311 = vector.broadcast %cst_59 : f32 to vector<8x128xf32>
    %312 = arith.addf %311, %310 : vector<8x128xf32>
    %313 = arith.divf %311, %312 : vector<8x128xf32>
    %314 = vector.extract_strided_slice %313 {offsets = [0, 0], sizes = [8, 32], strides = [1, 1]} : vector<8x128xf32> to vector<8x32xf32>
    %315 = vector.extract_strided_slice %313 {offsets = [0, 32], sizes = [8, 32], strides = [1, 1]} : vector<8x128xf32> to vector<8x32xf32>
    %316 = vector.extract_strided_slice %313 {offsets = [0, 96], sizes = [8, 32], strides = [1, 1]} : vector<8x128xf32> to vector<8x32xf32>
    %317 = vector.extract_strided_slice %308 {offsets = [0, 64], sizes = [8, 32], strides = [1, 1]} : vector<8x128xf32> to vector<8x32xf32>
    %318 = math.tanh %317 : vector<8x32xf32>
    %319 = arith.mulf %315, %303 : vector<8x32xf32>
    %320 = arith.mulf %314, %318 : vector<8x32xf32>
    %321 = arith.addf %319, %320 : vector<8x32xf32>
    %322 = math.tanh %321 : vector<8x32xf32>
    %323 = arith.mulf %316, %322 : vector<8x32xf32>
    %324 = tpu.concatenate %197, %215, %233, %251, %269, %287, %305, %323 in 0 : vector<8x32xf32>, vector<8x32xf32>, vector<8x32xf32>, vector<8x32xf32>, vector<8x32xf32>, vector<8x32xf32>, vector<8x32xf32>, vector<8x32xf32> -> vector<64x32xf32>
    %325 = arith.truncf %324 : vector<64x32xf32> to vector<64x32xbf16>
    %c0_60 = arith.constant 0 : index
    %c0_61 = arith.constant 0 : index
    %326 = vector.load %arg11[%c0_60, %c0_61] : memref<32x16xbf16, #tpu.memory_space<vmem>>, vector<32x16xbf16>
    %cst_62 = arith.constant dense<0.000000e+00> : vector<64x16xf32>
    %327 = tpu.matmul %325, %326, %cst_62 {dimension_numbers = #tpu.dot_dimension_numbers<[1], [0], [0], [1], [0, 0, 1, 1], [], []>} : vector<64x32xbf16>, vector<32x16xbf16>, vector<64x16xf32> -> vector<64x16xf32>
    %c0_63 = arith.constant 0 : index
    %c0_64 = arith.constant 0 : index
    %328 = vector.load %arg12[%c0_63, %c0_64] : memref<1x16xf32, #tpu.memory_space<vmem>>, vector<1x16xf32>
    %329 = vector.broadcast %328 : vector<1x16xf32> to vector<64x16xf32>
    %330 = arith.addf %327, %329 : vector<64x16xf32>
    %331 = tpu.concatenate %330, %170, %162, %163 in 1 : vector<64x16xf32>, vector<64x8xf32>, vector<64x8xf32>, vector<64x8xf32> -> vector<64x40xf32>
    %332 = vector.shape_cast %331 : vector<64x40xf32> to vector<8x8x40xf32>
    %c0_65 = arith.constant 0 : index
    %c0_66 = arith.constant 0 : index
    %c0_67 = arith.constant 0 : index
    %333 = vector.load %arg13[%c0_65, %c0_66, %c0_67] : memref<8x8x40xf32, #tpu.memory_space<vmem>>, vector<8x8x40xf32>
    tpu.vector_store %arg13[%c0_65, %c0_66, %c0_67], %332 {strides = array<i32>} : memref<8x8x40xf32, #tpu.memory_space<vmem>>, vector<8x8x40xf32>,
    return
  }
  func.func @transform_0(%arg0: i32) -> (i32, i32, i32) {
    %c0_i32 = arith.constant 0 : i32
    %c0_i32_0 = arith.constant 0 : i32
    %c0_i32_1 = arith.constant 0 : i32
    return %c0_i32, %arg0, %c0_i32_0 : i32, i32, i32
  }
  func.func @transform_1(%arg0: i32) -> (i32, i32, i32) {
    %c0_i32 = arith.constant 0 : i32
    %c0_i32_0 = arith.constant 0 : i32
    %c0_i32_1 = arith.constant 0 : i32
    return %c0_i32, %arg0, %c0_i32_0 : i32, i32, i32
  }
  func.func @transform_2(%arg0: i32) -> (i32, i32) {
    %c0_i32 = arith.constant 0 : i32
    %c0_i32_0 = arith.constant 0 : i32
    %c0_i32_1 = arith.constant 0 : i32
    return %c0_i32, %c0_i32_0 : i32, i32
  }
  func.func @transform_3(%arg0: i32) -> (i32, i32) {
    %c0_i32 = arith.constant 0 : i32
    %c0_i32_0 = arith.constant 0 : i32
    %c0_i32_1 = arith.constant 0 : i32
    return %c0_i32, %c0_i32_0 : i32, i32
  }
  func.func @transform_4(%arg0: i32) -> (i32, i32) {
    %c0_i32 = arith.constant 0 : i32
    %c0_i32_0 = arith.constant 0 : i32
    %c0_i32_1 = arith.constant 0 : i32
    return %c0_i32, %c0_i32_0 : i32, i32
  }
  func.func @transform_5(%arg0: i32) -> (i32, i32) {
    %c0_i32 = arith.constant 0 : i32
    %c0_i32_0 = arith.constant 0 : i32
    %c0_i32_1 = arith.constant 0 : i32
    return %c0_i32, %c0_i32_0 : i32, i32
  }
  func.func @transform_6(%arg0: i32) -> (i32, i32) {
    %c0_i32 = arith.constant 0 : i32
    %c0_i32_0 = arith.constant 0 : i32
    %c0_i32_1 = arith.constant 0 : i32
    return %c0_i32, %c0_i32_0 : i32, i32
  }
  func.func @transform_7(%arg0: i32) -> (i32, i32) {
    %c0_i32 = arith.constant 0 : i32
    %c0_i32_0 = arith.constant 0 : i32
    %c0_i32_1 = arith.constant 0 : i32
    return %c0_i32, %c0_i32_0 : i32, i32
  }
  func.func @transform_8(%arg0: i32) -> (i32, i32) {
    %c0_i32 = arith.constant 0 : i32
    %c0_i32_0 = arith.constant 0 : i32
    %c0_i32_1 = arith.constant 0 : i32
    return %c0_i32, %c0_i32_0 : i32, i32
  }
  func.func @transform_9(%arg0: i32) -> (i32, i32) {
    %c0_i32 = arith.constant 0 : i32
    %c0_i32_0 = arith.constant 0 : i32
    %c0_i32_1 = arith.constant 0 : i32
    return %c0_i32, %c0_i32_0 : i32, i32
  }
  func.func @transform_10(%arg0: i32) -> (i32, i32) {
    %c0_i32 = arith.constant 0 : i32
    %c0_i32_0 = arith.constant 0 : i32
    %c0_i32_1 = arith.constant 0 : i32
    return %c0_i32, %c0_i32_0 : i32, i32
  }
  func.func @transform_11(%arg0: i32) -> (i32, i32) {
    %c0_i32 = arith.constant 0 : i32
    %c0_i32_0 = arith.constant 0 : i32
    %c0_i32_1 = arith.constant 0 : i32
    return %c0_i32, %c0_i32_0 : i32, i32
  }
  func.func @transform_12(%arg0: i32) -> (i32, i32, i32) {
    %c0_i32 = arith.constant 0 : i32
    %c0_i32_0 = arith.constant 0 : i32
    %c0_i32_1 = arith.constant 0 : i32
    return %c0_i32, %arg0, %c0_i32_0 : i32, i32, i32
  }
}

</mosaic_0001>

<bundles_post_ra>
// kernel: lstm_vae_forward.1
= control target key start
LH: loop header
LB: loop body
LE: loop exit
PB: predicated region body
PF: predicated region fallthrough
CT: control target
= control target key end

     0   :  { %v2791_v1 = vmov 0.0   ;;  %vm2792_vm0 = vmmov 0   ;;  %vm69_vm1 = vcmask 130048   ;;  %s2794_s28 = smov 32   ;;  %vm151_vm2 = vcmask 261120   ;;  %s2797_s20 = smov 24   ;;  %s3507_s2 = inlined_call_operand.vmem [shape: bf16[16,128], index: 2, kind: input, shape index: {}]   ;;  %s3508_s0 = inlined_call_operand.vmem [shape: f32[8,8,16], index: 0, kind: input, shape index: {}]   ;;  %s3509_s3 = inlined_call_operand.vmem [shape: f32[32,128], index: 3, kind: input, shape index: {}]   ;;  %s3510_s4 = inlined_call_operand.vmem [shape: f32[1,128], index: 4, kind: input, shape index: {}]   ;;  %s3511_s5 = inlined_call_operand.vmem [shape: bf16[32,16], index: 5, kind: input, shape index: {}]   ;;  %s3512_s6 = inlined_call_operand.vmem [shape: f32[1,16], index: 6, kind: input, shape index: {}]   ;;  %s3513_s7 = inlined_call_operand.vmem [shape: bf16[8,128], index: 7, kind: input, shape index: {}]   ;;  %s3514_s8 = inlined_call_operand.vmem [shape: f32[32,128], index: 8, kind: input, shape index: {}]   ;;  %s3515_s1 = inlined_call_operand.vmem [shape: f32[8,8,8], index: 1, kind: input, shape index: {}]   ;;  %s3516_s9 = inlined_call_operand.vmem [shape: f32[1,128], index: 9, kind: input, shape index: {}]   ;;  %s3517_s10 = inlined_call_operand.vmem [shape: bf16[32,16], index: 10, kind: input, shape index: {}]   ;;  %s3518_s11 = inlined_call_operand.vmem [shape: f32[1,16], index: 11, kind: input, shape index: {}]   ;;  %s3519_s12 = inlined_call_operand.vmem [shape: f32[8,8,40], index: 12, kind: output, shape index: {}]  }
   0x1   :  { %v2642_v0 = vld [vmem:[%s3507_s2] sm:$0xff]   ;;  %2446 = vmatprep.subr.mxu0 %v2791_v1  ;;  %2454 = vmatprep.mubr.msk.f32.mxu0 %vm2792_vm0, %v2791_v1  ;;  %v43_v3 = vld [vmem:[%s3508_s0 + $0x8] sm:$0xff]  ;;  %v44_v4 = vld [vmem:[%s3508_s0 + $0x10] sm:$0xff]  ;;  %vm1171_vm3 = vcmask 1043456   ;;  %vm1158_vm4 = vcmask 64512   ;;  %vm2227_vm5 = vcmask 195584  }
   0x2   :  { %v42_v2 = vld [vmem:[%s3508_s0] sm:$0xff]  ;;  %2414 = vmatprep.subr.bf16.mxu1 %v2642_v0  ;;  %v45_v6 = vld [vmem:[%s3508_s0 + $0x18] sm:$0xff]  ;;  %v47_v10 = vld [vmem:[%s3508_s0 + $0x28] sm:$0xff]  ;;  %vm2244_vm6 = vcmask 326656  }
   0x3   :  { %v50_v5 = vpack.c.bf16 %v43_v3, %v42_v2  ;;  %v2884_v7 = vld [vmem:[%s3509_s3 + $0x18] sm:$0xff]  ;;  %2415 = vmatpush3.bf16.msra.mxu1 %v2642_v0  ;;  %v51_v8 = vpack.c.bf16 %v45_v6, %v44_v4  ;;  %v46_v9 = vld [vmem:[%s3508_s0 + $0x20] sm:$0xff]  ;;  %v2898_v12 = vld [vmem:[%s3509_s3 + $0x10] sm:$0xff] }
   0x4   :  { %2447 = vmatpush3.msra.mxu0 %v2884_v7  ;;  %2424 = vmatprep.subr.mxu1 %v2791_v1  ;;  %v52_v11 = vpack.c.bf16 %v47_v10, %v46_v9  ;;  %v48_v13 = vld [vmem:[%s3508_s0 + $0x30] sm:$0xff]  ;;  %v49_v14 = vld [vmem:[%s3508_s0 + $0x38] sm:$0xff]  ;;  %v2915_v15 = vld [vmem:[%s3509_s3 + $0x8] sm:$0xff] }
   0x5   :  { %2416 = vmatprep.mubr.msk.bf16.mxu1 %vm69_vm1, %v50_v5  ;;  %2448 = vmatprep.subr.mxu0 %v2791_v1  ;;  %v53_v16 = vpack.c.bf16 %v49_v14, %v48_v13  ;;  %v2924_v17 = vld [vmem:[%s3509_s3] sm:$0xff] }
   0x6   :  { %2417 = vmatmul.mubr.msk.bf16.vlgmr.msra.gmra.mxu1 %vm69_vm1, %v51_v8  ;;  %2449 = vmatpush3.msra.mxu0 %v2898_v12  ;;  %v2257_v18 = vld [vmem:[%s3510_s4] ss:$0 sm:$0xff]  ;;  %s2793_s4 = smov 64  }
   0x7   :  { %2425 = vmatpush3.msra.mxu1 %v2884_v7  ;;  %2420 = vmatprep.mubr.msk.bf16.mxu1 %vm69_vm1, %v52_v11 }
   0x8   :  { %2426 = vmatprep.subr.mxu1 %v2791_v1  ;;  %2450 = vmatprep.subr.mxu0 %v2791_v1 }
   0x9   :  { %2427 = vmatpush3.msra.mxu1 %v2898_v12  ;;  %2451 = vmatpush3.msra.mxu0 %v2915_v15 }
   0xa   :  { %2428 = vmatprep.subr.mxu1 %v2791_v1  ;;  %2452 = vmatprep.subr.mxu0 %v2791_v1 }
   0xb   :  { %2429 = vmatpush3.msra.mxu1 %v2915_v15  ;;  %2453 = vmatpush3.msra.mxu0 %v2924_v17 }
   0xc   :  { %2430 = vmatprep.subr.mxu1 %v2791_v1  ;;  %2468 = vmatprep.subr.mxu0 %v2791_v1 }
   0xd   :  { %2431 = vmatpush3.msra.mxu1 %v2924_v17 }
   0xe   :  { %2421 = vmatmul.mubr.msk.bf16.gmra.mxu1 %vm69_vm1, %v53_v16  ;;  %2435 = vmatprep.subr.mxu1 %v2791_v1 }
   0xf   :  { %2432 = vmatprep.mubr.msk.f32.mxu1 %vm2792_vm0, %v2791_v1 }
  0x16   :  { %2433 = vmatmul.mubr.f32.vlgmr.msra.gmra.mxu1 %v2791_v1 }
  0x17   :  { %2436 = vmatpush3.msra.mxu1 %v2884_v7  ;;  %2443 = vmatprep.mubr.msk.f32.mxu1 %vm2792_vm0, %v2791_v1 }
  0x18   :  { %2437 = vmatprep.subr.mxu1 %v2791_v1 }
  0x19   :  { %2438 = vmatpush3.msra.mxu1 %v2898_v12 }
  0x1a   :  { %2439 = vmatprep.subr.mxu1 %v2791_v1 }
  0x1b   :  { %2440 = vmatpush3.msra.mxu1 %v2915_v15 }
  0x1c   :  { %2441 = vmatprep.subr.mxu1 %v2791_v1 }
  0x1d   :  { %2442 = vmatpush3.msra.mxu1 %v2924_v17 }
  0x1e   :  { %2457 = vmatprep.subr.mxu1 %v2791_v1 }
  0xc6   :  { %v2418_v19 = vpop.f32.mrf.mxu1 }
  0xc7   :  { %v2950_v20 = vadd.f32 %v2418_v19, %v2257_v18 }
  0xc8   :  { %v116_v21 = vpop.f32.mrf.mxu1 }
  0xc9   :  { %v117_v33 = vadd.f32 %v2257_v18, %v116_v21 }
  0xca   :  { %v2419_v22 = vpop.f32.mrf.mxu1 }
  0xcb   :  { %v2952_v23 = vadd.f32 %v2419_v22, %v2257_v18 }
  0xcc   :  { %v119_v24 = vpop.f32.mrf.mxu1 }
  0xcd   :  { %v120_v25 = vadd.f32 %v2257_v18, %v119_v24 }
  0xce   :  { %v2422_v26 = vpop.f32.mrf.mxu1 }
  0xcf   :  { %v2954_v27 = vadd.f32 %v2422_v26, %v2257_v18 }
  0xd0   :  { %v132_v28 = vpop.f32.mrf.mxu1 }
  0xd1   :  { %v2956_v29 = vadd.f32 %v2257_v18, %v132_v28 }
  0xd2   :  { %v2423_v30 = vpop.f32.mrf.mxu1 }
  0xd3   :  { %v2958_v31 = vadd.f32 %v2423_v30, %v2257_v18 }
  0xd4   :  { %v135_v32 = vpop.f32.mrf.mxu1 }
  0xd5   :  { %v2960_v34 = vadd.f32 %v2257_v18, %v135_v32 }
  0xd6   :  { %v221_v35 = vpop.f32.mrf.mxu1 }
  0xd7   :  { %v225_v36 = vadd.f32 %v221_v35, %v117_v33 }
  0xd8   :  { %v2434_v37 = vpop.f32.mrf.mxu1 }
  0xd9   :  { %2647 = vtanh.f32 %v225_v36  ;;  %v2263_v39 = vmul.f32 -1.442695, %v225_v36 }
  0xdb   :  { %2649 = vpow2.f32 %v2263_v39 }
  0xe6   :  { %v2648_v38 = vpop.eup %2647 }
  0xe7   :  { %235 = vrot.lane.b32.xlu0 %v2648_v38, %s2793_s4 }
  0xe8   :  { %v2650_v40 = vpop.eup %2649 }
  0xe9   :  { %v229_v41 = vadd.f32 1.0, %v2650_v40 }
  0xeb   :  { %2651 = vrcp.f32 %v229_v41 }
  0xf8   :  { %v2652_v42 = vpop.eup %2651 }
  0xf9   :  { %v233_v45 = vmul.f32 0.0, %v2652_v42 }
 0x159   :  { %v236_v43 = vpop.permute.xlu0 %235 }
 0x15a   :  { %v238_v44 = vmul.f32 %v2652_v42, %v236_v43 }
 0x15c   :  { %240 = vrot.lane.b32.xlu0 %v238_v44, %s2794_s28 }
 0x1ce   :  { %v241_v46 = vpop.permute.xlu0 %240 }
 0x1cf   :  { %v243_v47 = vadd.f32 %v241_v46, %v233_v45 }
 0x1d1   :  { %2653 = vtanh.f32 %v243_v47 }
 0x1de   :  { %v2654_v48 = vpop.eup %2653 }
 0x1df   :  { %246 = vrot.lane.b32.xlu1 %v2654_v48, %s2793_s4 }
 0x251   :  { %v247_v49 = vpop.permute.xlu1 %246 }
 0x252   :  { %v2965_v50 = vmul.f32 %v2652_v42, %v247_v49 }
 0x254   :  { %251 = vrot.lane.b32.xlu1 %v2965_v50, %s2794_s28 }
 0x2c6   :  { %v252_v51 = vpop.permute.xlu1 %251 }
 0x2c7   :  { %2444 = vmatmul.mubr.msk.f32.vlgmr.msra.gmra.mxu1 %vm151_vm2, %v252_v51 }
 0x2c8   :  { %2458 = vmatpush3.msra.mxu1 %v2884_v7  ;;  %2465 = vmatprep.mubr.msk.f32.mxu1 %vm2792_vm0, %v2791_v1 }
 0x2c9   :  { %2459 = vmatprep.subr.mxu1 %v2791_v1 }
 0x2ca   :  { %2460 = vmatpush3.msra.mxu1 %v2898_v12 }
 0x2cb   :  { %2461 = vmatprep.subr.mxu1 %v2791_v1 }
 0x2cc   :  { %2462 = vmatpush3.msra.mxu1 %v2915_v15 }
 0x2cd   :  { %2463 = vmatprep.subr.mxu1 %v2791_v1 }
 0x2ce   :  { %2464 = vmatpush3.msra.mxu1 %v2924_v17 }
 0x2cf   :  { %2479 = vmatprep.subr.mxu1 %v2791_v1 }
 0x387   :  { %v321_v52 = vpop.f32.mrf.mxu1 }
 0x388   :  { %v325_v53 = vadd.f32 %v321_v52, %v120_v25 }
 0x389   :  { %v2445_v54 = vpop.f32.mrf.mxu1 }
 0x38a   :  { %2655 = vtanh.f32 %v325_v53  ;;  %v2265_v56 = vmul.f32 -1.442695, %v325_v53 }
 0x38c   :  { %2657 = vpow2.f32 %v2265_v56 }
 0x397   :  { %v2656_v55 = vpop.eup %2655 }
 0x398   :  { %335 = vrot.lane.b32.xlu0 %v2656_v55, %s2793_s4 }
 0x399   :  { %v2658_v57 = vpop.eup %2657 }
 0x39a   :  { %v329_v58 = vadd.f32 1.0, %v2658_v57 }
 0x39c   :  { %2659 = vrcp.f32 %v329_v58 }
 0x3a9   :  { %v2660_v59 = vpop.eup %2659 }
 0x3aa   :  { %v333_v62 = vmul.f32 %v2660_v59, %v243_v47 }
 0x40a   :  { %v336_v60 = vpop.permute.xlu0 %335 }
 0x40b   :  { %v338_v61 = vmul.f32 %v2660_v59, %v336_v60 }
 0x40d   :  { %340 = vrot.lane.b32.xlu1 %v338_v61, %s2794_s28 }
 0x47f   :  { %v341_v63 = vpop.permute.xlu1 %340 }
 0x480   :  { %v343_v0 = vadd.f32 %v341_v63, %v333_v62 }
 0x482   :  { %2661 = vtanh.f32 %v343_v0 }
 0x48f   :  { %v2662_v2 = vpop.eup %2661 }
 0x490   :  { %346 = vrot.lane.b32.xlu0 %v2662_v2, %s2793_s4 }
 0x502   :  { %v347_v3 = vpop.permute.xlu0 %346 }
 0x503   :  { %v2983_v4 = vmul.f32 %v2660_v59, %v347_v3 }
 0x505   :  { %351 = vrot.lane.b32.xlu1 %v2983_v4, %s2794_s28 }
 0x577   :  { %v352_v5 = vpop.permute.xlu1 %351 }
 0x578   :  { %2455 = vmatmul.mubr.msk.f32.vlgmr.msra.gmra.mxu0 %vm151_vm2, %v352_v5 }
 0x579   :  { %2469 = vmatpush3.msra.mxu0 %v2884_v7  ;;  %2476 = vmatprep.mubr.msk.f32.mxu0 %vm2792_vm0, %v2791_v1 }
 0x57a   :  { %2470 = vmatprep.subr.mxu0 %v2791_v1 }
 0x57b   :  { %2471 = vmatpush3.msra.mxu0 %v2898_v12 }
 0x57c   :  { %2472 = vmatprep.subr.mxu0 %v2791_v1 }
 0x57d   :  { %2473 = vmatpush3.msra.mxu0 %v2915_v15 }
 0x57e   :  { %2474 = vmatprep.subr.mxu0 %v2791_v1 }
 0x57f   :  { %2475 = vmatpush3.msra.mxu0 %v2924_v17 }
 0x580   :  { %2490 = vmatprep.subr.mxu0 %v2791_v1 }
 0x638   :  { %v421_v6 = vpop.f32.mrf.mxu0 }
 0x639   :  { %v425_v8 = vadd.f32 %v421_v6, %v2950_v20 }
 0x63a   :  { %v2456_v9 = vpop.f32.mrf.mxu0 }
 0x63b   :  { %2663 = vtanh.f32 %v425_v8  ;;  %v2267_v11 = vmul.f32 -1.442695, %v425_v8 }
 0x63d   :  { %2665 = vpow2.f32 %v2267_v11 }
 0x648   :  { %v2664_v10 = vpop.eup %2663 }
 0x649   :  { %435 = vrot.lane.b32.xlu0 %v2664_v10, %s2793_s4 }
 0x64a   :  { %v2666_v13 = vpop.eup %2665 }
 0x64b   :  { %v429_v14 = vadd.f32 1.0, %v2666_v13 }
 0x64d   :  { %2667 = vrcp.f32 %v429_v14 }
 0x65a   :  { %v2668_v16 = vpop.eup %2667 }
 0x65b   :  { %v433_v21 = vmul.f32 %v2668_v16, %v343_v0 }
 0x6bb   :  { %v436_v18 = vpop.permute.xlu0 %435 }
 0x6bc   :  { %v438_v19 = vmul.f32 %v2668_v16, %v436_v18 }
 0x6be   :  { %440 = vrot.lane.b32.xlu1 %v438_v19, %s2794_s28 }
 0x730   :  { %v441_v22 = vpop.permute.xlu1 %440 }
 0x731   :  { %v443_v24 = vadd.f32 %v441_v22, %v433_v21 }
 0x733   :  { %2669 = vtanh.f32 %v443_v24 }
 0x740   :  { %v2670_v20 = vpop.eup %2669 }
 0x741   :  { %446 = vrot.lane.b32.xlu0 %v2670_v20, %s2793_s4 }
 0x7b3   :  { %v447_v25 = vpop.permute.xlu0 %446 }
 0x7b4   :  { %v3002_v26 = vmul.f32 %v2668_v16, %v447_v25 }
 0x7b6   :  { %451 = vrot.lane.b32.xlu1 %v3002_v26, %s2794_s28 }
 0x828   :  { %v452_v28 = vpop.permute.xlu1 %451 }
 0x829   :  { %2466 = vmatmul.mubr.msk.f32.vlgmr.msra.gmra.mxu1 %vm151_vm2, %v452_v28 }
 0x82a   :  { %2480 = vmatpush3.msra.mxu1 %v2884_v7  ;;  %2487 = vmatprep.mubr.msk.f32.mxu1 %vm2792_vm0, %v2791_v1 }
 0x82b   :  { %2481 = vmatprep.subr.mxu1 %v2791_v1 }
 0x82c   :  { %2482 = vmatpush3.msra.mxu1 %v2898_v12 }
 0x82d   :  { %2483 = vmatprep.subr.mxu1 %v2791_v1 }
 0x82e   :  { %2484 = vmatpush3.msra.mxu1 %v2915_v15 }
 0x82f   :  { %2485 = vmatprep.subr.mxu1 %v2791_v1 }
 0x830   :  { %2486 = vmatpush3.msra.mxu1 %v2924_v17 }
 0x831   :  { %2501 = vmatprep.subr.mxu1 %v2791_v1 }
 0x8e9   :  { %v521_v30 = vpop.f32.mrf.mxu1 }
 0x8ea   :  { %v525_v32 = vadd.f32 %v521_v30, %v2952_v23 }
 0x8eb   :  { %v2467_v33 = vpop.f32.mrf.mxu1 }
 0x8ec   :  { %2671 = vtanh.f32 %v525_v32  ;;  %v2269_v36 = vmul.f32 -1.442695, %v525_v32 }
 0x8ee   :  { %2673 = vpow2.f32 %v2269_v36 }
 0x8f9   :  { %v2672_v35 = vpop.eup %2671 }
 0x8fa   :  { %535 = vrot.lane.b32.xlu0 %v2672_v35, %s2793_s4 }
 0x8fb   :  { %v2674_v37 = vpop.eup %2673 }
 0x8fc   :  { %v529_v38 = vadd.f32 1.0, %v2674_v37 }
 0x8fe   :  { %2675 = vrcp.f32 %v529_v38 }
 0x90b   :  { %v2676_v39 = vpop.eup %2675 }
 0x90c   :  { %v533_v42 = vmul.f32 %v2676_v39, %v443_v24 }
 0x96c   :  { %v536_v40 = vpop.permute.xlu0 %535 }
 0x96d   :  { %v538_v41 = vmul.f32 %v2676_v39, %v536_v40  ;;  %v2644_v40 = vld [vmem:[%s3511_s5] sm:$0xff]  }
 0x96f   :  { %540 = vrot.lane.b32.xlu1 %v538_v41, %s2794_s28 }
 0x9e1   :  { %v541_v43 = vpop.permute.xlu1 %540 }
 0x9e2   :  { %v543_v44 = vadd.f32 %v541_v43, %v533_v42 }
 0x9e4   :  { %2677 = vtanh.f32 %v543_v44 }
 0x9f1   :  { %v2678_v23 = vpop.eup %2677 }
 0x9f2   :  { %546 = vrot.lane.b32.xlu0 %v2678_v23, %s2793_s4 }
 0xa64   :  { %v547_v45 = vpop.permute.xlu0 %546 }
 0xa65   :  { %v3021_v46 = vmul.f32 %v2676_v39, %v547_v45  ;;  %v950_v39 = vpack.c.bf16 %v2983_v4, %v2965_v50 }
 0xa67   :  { %551 = vrot.lane.b32.xlu1 %v3021_v46, %s2794_s28  ;;  %v951_v50 = vpack.c.bf16 %v3021_v46, %v3002_v26 }
 0xad9   :  { %v552_v47 = vpop.permute.xlu1 %551 }
 0xada   :  { %2477 = vmatmul.mubr.msk.f32.vlgmr.msra.gmra.mxu0 %vm151_vm2, %v552_v47 }
 0xadb   :  { %2491 = vmatpush3.msra.mxu0 %v2884_v7  ;;  %2498 = vmatprep.mubr.msk.f32.mxu0 %vm2792_vm0, %v2791_v1 }
 0xadc   :  { %2492 = vmatprep.subr.mxu0 %v2791_v1 }
 0xadd   :  { %2493 = vmatpush3.msra.mxu0 %v2898_v12 }
 0xade   :  { %2494 = vmatprep.subr.mxu0 %v2791_v1 }
 0xadf   :  { %2495 = vmatpush3.msra.mxu0 %v2915_v15 }
 0xae0   :  { %2496 = vmatprep.subr.mxu0 %v2791_v1 }
 0xae1   :  { %2497 = vmatpush3.msra.mxu0 %v2924_v17 }
 0xb9a   :  { %v621_v48 = vpop.f32.mrf.mxu0 }
 0xb9b   :  { %v625_v49 = vadd.f32 %v621_v48, %v2956_v29 }
 0xb9c   :  { %v2478_v51 = vpop.f32.mrf.mxu0 }
 0xb9d   :  { %2679 = vtanh.f32 %v625_v49  ;;  %v2271_v53 = vmul.f32 -1.442695, %v625_v49 }
 0xb9f   :  { %2681 = vpow2.f32 %v2271_v53 }
 0xbaa   :  { %v2680_v52 = vpop.eup %2679 }
 0xbab   :  { %635 = vrot.lane.b32.xlu0 %v2680_v52, %s2793_s4  ;;  %v3094_v52 = vld [vmem:[%s3512_s6] ss:$0 sm:$0xff]  ;;  %s2795_s6 = smov 120  }
 0xbac   :  { %v2682_v54 = vpop.eup %2681 }
 0xbad   :  { %v629_v55 = vadd.f32 1.0, %v2682_v54 }
 0xbaf   :  { %2683 = vrcp.f32 %v629_v55 }
 0xbbc   :  { %v2684_v56 = vpop.eup %2683 }
 0xbbd   :  { %v633_v59 = vmul.f32 %v2684_v56, %v543_v44 }
 0xc1d   :  { %v636_v57 = vpop.permute.xlu0 %635 }
 0xc1e   :  { %v638_v58 = vmul.f32 %v2684_v56, %v636_v57 }
 0xc20   :  { %640 = vrot.lane.b32.xlu1 %v638_v58, %s2794_s28 }
 0xc92   :  { %v641_v60 = vpop.permute.xlu1 %640 }
 0xc93   :  { %v643_v61 = vadd.f32 %v641_v60, %v633_v59 }
 0xc95   :  { %2685 = vtanh.f32 %v643_v61 }
 0xca2   :  { %v2686_v29 = vpop.eup %2685 }
 0xca3   :  { %646 = vrot.lane.b32.xlu0 %v2686_v29, %s2793_s4 }
 0xd15   :  { %v647_v62 = vpop.permute.xlu0 %646 }
 0xd16   :  { %v3039_v63 = vmul.f32 %v2684_v56, %v647_v62 }
 0xd18   :  { %651 = vrot.lane.b32.xlu1 %v3039_v63, %s2794_s28 }
 0xd8a   :  { %v652_v0 = vpop.permute.xlu1 %651 }
 0xd8b   :  { %2488 = vmatmul.mubr.msk.f32.vlgmr.msra.gmra.mxu1 %vm151_vm2, %v652_v0 }
 0xd8c   :  { %2502 = vmatpush3.msra.mxu1 %v2884_v7  ;;  %2509 = vmatprep.mubr.msk.f32.mxu1 %vm2792_vm0, %v2791_v1 }
 0xd8d   :  { %2503 = vmatprep.subr.mxu1 %v2791_v1 }
 0xd8e   :  { %2504 = vmatpush3.msra.mxu1 %v2898_v12 }
 0xd8f   :  { %2505 = vmatprep.subr.mxu1 %v2791_v1 }
 0xd90   :  { %2506 = vmatpush3.msra.mxu1 %v2915_v15 }
 0xd91   :  { %2507 = vmatprep.subr.mxu1 %v2791_v1 }
 0xd92   :  { %2508 = vmatpush3.msra.mxu1 %v2924_v17 }
 0xe4b   :  { %v721_v2 = vpop.f32.mrf.mxu1 }
 0xe4c   :  { %v725_v3 = vadd.f32 %v721_v2, %v2960_v34 }
 0xe4d   :  { %v2489_v5 = vpop.f32.mrf.mxu1 }
 0xe4e   :  { %2687 = vtanh.f32 %v725_v3  ;;  %v2273_v6 = vmul.f32 -1.442695, %v725_v3 }
 0xe50   :  { %2689 = vpow2.f32 %v2273_v6 }
 0xe5b   :  { %v2688_v7 = vpop.eup %2687 }
 0xe5c   :  { %735 = vrot.lane.b32.xlu0 %v2688_v7, %s2793_s4 }
 0xe5d   :  { %v2690_v8 = vpop.eup %2689 }
 0xe5e   :  { %v729_v12 = vadd.f32 1.0, %v2690_v8 }
 0xe60   :  { %2691 = vrcp.f32 %v729_v12 }
 0xe6d   :  { %v2692_v9 = vpop.eup %2691 }
 0xe6e   :  { %v733_v11 = vmul.f32 %v2692_v9, %v643_v61 }
 0xece   :  { %v736_v10 = vpop.permute.xlu0 %735 }
 0xecf   :  { %v738_v15 = vmul.f32 %v2692_v9, %v736_v10 }
 0xed1   :  { %740 = vrot.lane.b32.xlu1 %v738_v15, %s2794_s28 }
 0xf43   :  { %v741_v17 = vpop.permute.xlu1 %740 }
 0xf44   :  { %v743_v13 = vadd.f32 %v741_v17, %v733_v11 }
 0xf46   :  { %2693 = vtanh.f32 %v743_v13 }
 0xf53   :  { %v2694_v34 = vpop.eup %2693 }
 0xf54   :  { %746 = vrot.lane.b32.xlu0 %v2694_v34, %s2793_s4  ;;  %v1150_v34 = vld [vmem:[%s3513_s7] sm:$0xf] }
 0xf55   :  { %2634 = vmatprep.subr.msk.bf16.mxu1 %vm1171_vm3, %v1150_v34 }
 0xfc6   :  { %v747_v14 = vpop.permute.xlu0 %746 }
 0xfc7   :  { %v3057_v16 = vmul.f32 %v2692_v9, %v747_v14  ;;  %v1173_v14 = vsel %vm1171_vm3, %v1150_v34, 0 }
 0xfc9   :  { %751 = vrot.lane.b32.xlu1 %v3057_v16, %s2794_s28  ;;  %v952_v0 = vpack.c.bf16 %v3057_v16, %v3039_v63 }
0x103b   :  { %v752_v18 = vpop.permute.xlu1 %751 }
0x103c   :  { %2499 = vmatmul.mubr.msk.f32.vlgmr.msra.gmra.mxu0 %vm151_vm2, %v752_v18  ;;  %v3128_v18 = vld [vmem:[%s3514_s8 + $0x18] sm:$0xff] }
0x10fc   :  { %v821_v19 = vpop.f32.mrf.mxu0 }
0x10fd   :  { %v825_v21 = vadd.f32 %v821_v19, %v2954_v27  ;;  %v2643_v27 = vld [vmem:[%s3511_s5 + $0x8] sm:$0xff]   ;;  %v3133_v19 = vld [vmem:[%s3514_s8 + $0x10] sm:$0xff] }
0x10fe   :  { %v2500_v22 = vpop.f32.mrf.mxu0  ;;  %2512 = vmatprep.subr.bf16.mxu0 %v2643_v27 }
0x10ff   :  { %2695 = vtanh.f32 %v825_v21  ;;  %v2275_v20 = vmul.f32 -1.442695, %v825_v21  ;;  %2513 = vmatpush3.bf16.msra.mxu0 %v2643_v27 }
0x1100   :  { %2514 = vmatprep.subr.bf16.mxu0 %v2644_v40 }
0x1101   :  { %2697 = vpow2.f32 %v2275_v20  ;;  %v3149_v20 = vld [vmem:[%s3514_s8] sm:$0xff] }
0x1103   :  { %2515 = vmatpush3.bf16.msra.mxu0 %v2644_v40 }
0x1104   :  { %2534 = vmatprep.subr.mxu0 %v2791_v1 }
0x110c   :  { %v2696_v24 = vpop.eup %2695 }
0x110d   :  { %835 = vrot.lane.b32.xlu0 %v2696_v24, %s2793_s4  ;;  %v3144_v24 = vld [vmem:[%s3514_s8 + $0x8] sm:$0xff] }
0x110e   :  { %v2698_v25 = vpop.eup %2697 }
0x110f   :  { %v829_v28 = vadd.f32 1.0, %v2698_v25  ;;  %v1066_v25 = vld [vmem:[%s3515_s1] sm:$0xff] }
0x1111   :  { %2699 = vrcp.f32 %v829_v28 }
0x111e   :  { %v2700_v30 = vpop.eup %2699 }
0x111f   :  { %v833_v35 = vmul.f32 %v2700_v30, %v743_v13 }
0x117f   :  { %v836_v32 = vpop.permute.xlu0 %835 }
0x1180   :  { %v838_v33 = vmul.f32 %v2700_v30, %v836_v32  ;;  %v1067_v32 = vld [vmem:[%s3515_s1 + $0x8] sm:$0xff] }
0x1182   :  { %840 = vrot.lane.b32.xlu1 %v838_v33, %s2794_s28 }
0x11f4   :  { %v841_v36 = vpop.permute.xlu1 %840 }
0x11f5   :  { %v3065_v37 = vadd.f32 %v841_v36, %v833_v35  ;;  %v1068_v36 = vld [vmem:[%s3515_s1 + $0x10] sm:$0xff] }
0x11f7   :  { %2701 = vtanh.f32 %v3065_v37 }
0x1204   :  { %v2702_v38 = vpop.eup %2701 }
0x1205   :  { %846 = vrot.lane.b32.xlu0 %v2702_v38, %s2793_s4  ;;  %v1069_v38 = vld [vmem:[%s3515_s1 + $0x18] sm:$0xff] }
0x1209   :  { %969 = vrot.lane.b32.xlu0 %v950_v39, %s2794_s28 }
0x1277   :  { %v847_v41 = vpop.permute.xlu0 %846 }
0x1278   :  { %v3079_v42 = vmul.f32 %v2700_v30, %v847_v41 }
0x127a   :  { %851 = vrot.lane.b32.xlu1 %v3079_v42, %s2794_s28 }
0x127b   :  { %v970_v43 = vpop.permute.xlu0 %969 }
0x127c   :  { %2516 = vmatprep.mubr.msk.bf16.mxu0 %vm151_vm2, %v970_v43 }
0x127e   :  { %971 = vrot.lane.b32.xlu1 %v951_v50, %s2794_s28 }
0x12ec   :  { %v852_v4 = vpop.permute.xlu1 %851 }
0x12ed   :  { %2510 = vmatmul.mubr.msk.f32.vlgmr.msra.gmra.mxu1 %vm151_vm2, %v852_v4 }
0x12ee   :  { %2525 = vmatpush3.bf16.msra.mxu1 %v1173_v14 }
0x12ef   :  { %2545 = vmatprep.subr.mxu1 %v2791_v1 }
0x12f0   :  { %v972_v44 = vpop.permute.xlu1 %971 }
0x12f1   :  { %2517 = vmatmul.mubr.msk.bf16.vlgmr.msra.gmra.mxu0 %vm151_vm2, %v972_v44 }
0x12f2   :  { %2535 = vmatpush3.msra.mxu0 %v3128_v18 }
0x12f3   :  { %2536 = vmatprep.subr.mxu0 %v2791_v1 }
0x12f4   :  { %2537 = vmatpush3.msra.mxu0 %v3133_v19 }
0x12f5   :  { %2538 = vmatprep.subr.mxu0 %v2791_v1 }
0x12f6   :  { %2539 = vmatpush3.msra.mxu0 %v3144_v24 }
0x12f7   :  { %2540 = vmatprep.subr.mxu0 %v2791_v1 }
0x12f8   :  { %2541 = vmatpush3.msra.mxu0 %v3149_v20 }
0x12f9   :  { %2556 = vmatprep.subr.mxu0 %v2791_v1 }
0x13ad   :  { %v921_v23 = vpop.f32.mrf.mxu1 }
0x13ae   :  { %v925_v45 = vadd.f32 %v921_v23, %v2958_v31 }
0x13af   :  { %v2511_v47 = vpop.f32.mrf.mxu1 }
0x13b0   :  { %2703 = vtanh.f32 %v925_v45  ;;  %v2277_v49 = vmul.f32 -1.442695, %v925_v45 }
0x13b1   :  { %v2518_v26 = vpop.f32.mrf.mxu0 }
0x13b2   :  { %2705 = vpow2.f32 %v2277_v49  ;;  %v3100_v31 = vadd.f32 %v2518_v26, %v3094_v52 }
0x13b3   :  { %v1035_v46 = vpop.f32.mrf.mxu0 }
0x13b4   :  { %v3097_v53 = vadd.f32 %v3094_v52, %v1035_v46  ;;  %v1076_v56 = vmul.f32 0.5, %v3100_v31 }
0x13b5   :  { %v2519_v2 = vpop.f32.mrf.mxu0 }
0x13b6   :  { %v1074_v55 = vmul.f32 0.5, %v3097_v53  ;;  %v1086_v58 = vmul.f32 1.442695, %v1076_v56  ;;  %v3114_v7 = vadd.f32 %v2519_v2, %v3094_v52 }
0x13b7   :  { %v1038_v3 = vpop.f32.mrf.mxu0 }
0x13b8   :  { %v1082_v57 = vmul.f32 1.442695, %v1074_v55  ;;  %v3111_v5 = vadd.f32 %v3094_v52, %v1038_v3  ;;  %v1077_v10 = vmul.f32 0.5, %v3114_v7 }
0x13ba   :  { %v1075_v6 = vmul.f32 0.5, %v3111_v5  ;;  %v1088_v11 = vmul.f32 1.442695, %v1077_v10 }
0x13bc   :  { %v1084_v15 = vmul.f32 1.442695, %v1075_v6 }
0x13bd   :  { %v2704_v48 = vpop.eup %2703 }
0x13be   :  { %935 = vrot.lane.b32.xlu0 %v2704_v48, %s2793_s4 }
0x13bf   :  { %v2706_v51 = vpop.eup %2705 }
0x13c0   :  { %v929_v54 = vadd.f32 1.0, %v2706_v51  ;;  %v3214_v51 = vld [vmem:[%s3516_s9] ss:$0 sm:$0xff] }
0x13c2   :  { %2707 = vrcp.f32 %v929_v54 }
0x13c3   :  { %2709 = vpow2.f32 %v1082_v57 }
0x13c4   :  { %2711 = vpow2.f32 %v1086_v58 }
0x13cf   :  { %v2708_v59 = vpop.eup %2707 }
0x13d0   :  { %v2710_v29 = vpop.eup %2709  ;;  %v933_v8 = vmul.f32 %v2708_v59, %v3065_v37 }
0x13d1   :  { %v2712_v62 = vpop.eup %2711 }
0x1430   :  { %v936_v60 = vpop.permute.xlu0 %935 }
0x1431   :  { %v938_v61 = vmul.f32 %v2708_v59, %v936_v60 }
0x1433   :  { %940 = vrot.lane.b32.xlu1 %v938_v61, %s2794_s28 }
0x1437   :  { %1106 = vrot.lane.b32.xlu1 %v2710_v29, %s2795_s6 }
0x143b   :  { %1110 = vrot.lane.b32.xlu1 %v2712_v62, %s2795_s6 }
0x143f   :  { %973 = vrot.lane.b32.xlu1 %v952_v0, %s2794_s28 }
0x14a5   :  { %v941_v12 = vpop.permute.xlu1 %940 }
0x14a6   :  { %v943_v9 = vadd.f32 %v941_v12, %v933_v8 }
0x14a8   :  { %2713 = vtanh.f32 %v943_v9 }
0x14a9   :  { %v1107_v63 = vpop.permute.xlu1 %1106  ;;  %2715 = vpow2.f32 %v1084_v15 }
0x14aa   :  { %2717 = vpow2.f32 %v1088_v11  ;;  %v1130_v33 = vmul.f32 %v1107_v63, %v1066_v25 }
0x14ac   :  { %v3170_v39 = vadd.f32 %v1130_v33, %v3097_v53  ;;  %v1070_v33 = vld [vmem:[%s3515_s1 + $0x20] sm:$0xff] }
0x14ad   :  { %v1111_v17 = vpop.permute.xlu1 %1110 }
0x14ae   :  { %v1132_v40 = vmul.f32 %v1111_v17, %v1068_v36 }
0x14b0   :  { %v3178_v4 = vadd.f32 %v1132_v40, %v3100_v31 }
0x14b1   :  { %v974_v13 = vpop.permute.xlu1 %973 }
0x14b2   :  { %2520 = vmatprep.mubr.msk.bf16.mxu0 %vm151_vm2, %v974_v13 }
0x14b5   :  { %v2714_v16 = vpop.eup %2713 }
0x14b6   :  { %946 = vrot.lane.b32.xlu0 %v2714_v16, %s2793_s4  ;;  %v2716_v21 = vpop.eup %2715 }
0x14b7   :  { %v2718_v22 = vpop.eup %2717 }
0x14ba   :  { %1108 = vrot.lane.b32.xlu0 %v2716_v21, %s2795_s6 }
0x14be   :  { %1112 = vrot.lane.b32.xlu0 %v2718_v22, %s2795_s6 }
0x1528   :  { %v947_v28 = vpop.permute.xlu0 %946 }
0x1529   :  { %v949_v30 = vmul.f32 %v2708_v59, %v947_v28 }
0x152b   :  { %v953_v35 = vpack.c.bf16 %v949_v30, %v3079_v42 }
0x152c   :  { %v1109_v37 = vpop.permute.xlu0 %1108 }
0x152d   :  { %v1131_v27 = vmul.f32 %v1109_v37, %v1067_v32  ;;  %975 = vrot.lane.b32.xlu0 %v953_v35, %s2794_s28  ;;  %v1071_v37 = vld [vmem:[%s3515_s1 + $0x28] sm:$0xff] }
0x152f   :  { %v3173_v41 = vadd.f32 %v1131_v27, %v3111_v5 }
0x1530   :  { %v1113_v42 = vpop.permute.xlu0 %1112 }
0x1531   :  { %v1146_v43 = vpack.c.bf16 %v3173_v41, %v3170_v39  ;;  %v1133_v50 = vmul.f32 %v1113_v42, %v1069_v38  ;;  %v1072_v38 = vld [vmem:[%s3515_s1 + $0x30] sm:$0xff] }
0x1533   :  { %v3181_v44 = vadd.f32 %v1133_v50, %v3114_v7  ;;  %2526 = vmatprep.mubr.msk.bf16.mxu1 %vm1158_vm4, %v1146_v43  ;;  %v1073_v50 = vld [vmem:[%s3515_s1 + $0x38] sm:$0xff]  ;;  %s2796_s1 = smov 16  }
0x1535   :  { %v1147_v23 = vpack.c.bf16 %v3181_v44, %v3178_v4 }
0x1537   :  { %2527 = vmatmul.mubr.msk.bf16.vlgmr.msra.gmra.mxu1 %vm1158_vm4, %v1147_v23 }
0x1538   :  { %2546 = vmatpush3.msra.mxu1 %v3128_v18 }
0x1539   :  { %2547 = vmatprep.subr.mxu1 %v2791_v1 }
0x153a   :  { %2548 = vmatpush3.msra.mxu1 %v3133_v19 }
0x153b   :  { %2549 = vmatprep.subr.mxu1 %v2791_v1 }
0x153c   :  { %2550 = vmatpush3.msra.mxu1 %v3144_v24 }
0x153d   :  { %2551 = vmatprep.subr.mxu1 %v2791_v1 }
0x153e   :  { %2552 = vmatpush3.msra.mxu1 %v3149_v20 }
0x153f   :  { %2567 = vmatprep.subr.mxu1 %v2791_v1 }
0x159f   :  { %v976_v45 = vpop.permute.xlu0 %975 }
0x15a0   :  { %2521 = vmatmul.mubr.msk.bf16.gmra.mxu0 %vm151_vm2, %v976_v45 }
0x15a1   :  { %2542 = vmatprep.mubr.msk.f32.mxu0 %vm2792_vm0, %v2791_v1 }
0x15a8   :  { %2543 = vmatmul.mubr.f32.vlgmr.msra.gmra.mxu0 %v2791_v1 }
0x15a9   :  { %2557 = vmatpush3.msra.mxu0 %v3128_v18  ;;  %2564 = vmatprep.mubr.msk.f32.mxu0 %vm2792_vm0, %v2791_v1 }
0x15aa   :  { %2558 = vmatprep.subr.mxu0 %v2791_v1 }
0x15ab   :  { %2559 = vmatpush3.msra.mxu0 %v3133_v19 }
0x15ac   :  { %2560 = vmatprep.subr.mxu0 %v2791_v1 }
0x15ad   :  { %2561 = vmatpush3.msra.mxu0 %v3144_v24 }
0x15ae   :  { %2562 = vmatprep.subr.mxu0 %v2791_v1 }
0x15af   :  { %2563 = vmatpush3.msra.mxu0 %v3149_v20 }
0x15b0   :  { %2578 = vmatprep.subr.mxu0 %v2791_v1 }
0x15f7   :  { %v3209_v47 = vpop.f32.mrf.mxu1 }
0x15f9   :  { %v1209_v26 = vpop.f32.mrf.mxu1 }
0x15fa   :  { %v1210_v55 = vadd.f32 %v3214_v51, %v1209_v26 }
0x1660   :  { %v2522_v48 = vpop.f32.mrf.mxu0 }
0x1661   :  { %v3222_v0 = vadd.f32 %v2522_v48, %v3094_v52 }
0x1662   :  { %v1051_v49 = vpop.f32.mrf.mxu0 }
0x1663   :  { %v3219_v29 = vadd.f32 %v3094_v52, %v1051_v49  ;;  %v1080_v3 = vmul.f32 0.5, %v3222_v0 }
0x1664   :  { %v2523_v46 = vpop.f32.mrf.mxu0 }
0x1665   :  { %v1078_v2 = vmul.f32 0.5, %v3219_v29  ;;  %v1094_v8 = vmul.f32 1.442695, %v1080_v3  ;;  %v3233_v17 = vadd.f32 %v2523_v46, %v3094_v52 }
0x1666   :  { %v1054_v54 = vpop.f32.mrf.mxu0 }
0x1667   :  { %v1090_v6 = vmul.f32 1.442695, %v1078_v2  ;;  %v3230_v11 = vadd.f32 %v3094_v52, %v1054_v54  ;;  %v1081_v21 = vmul.f32 0.5, %v3233_v17 }
0x1668   :  { %v1310_v56 = vpop.f32.mrf.mxu0 }
0x1669   :  { %v1314_v57 = vadd.f32 %v1310_v56, %v1210_v55  ;;  %v1079_v13 = vmul.f32 0.5, %v3230_v11  ;;  %v1096_v25 = vmul.f32 1.442695, %v1081_v21 }
0x166a   :  { %v2544_v58 = vpop.f32.mrf.mxu0 }
0x166b   :  { %2719 = vtanh.f32 %v1314_v57  ;;  %v2290_v60 = vmul.f32 -1.442695, %v1314_v57  ;;  %v1092_v22 = vmul.f32 1.442695, %v1079_v13  ;;  %v3290_v58 = vpop.f32.mrf.mxu1 }
0x166d   :  { %2721 = vpow2.f32 %v2290_v60 }
0x1678   :  { %v2720_v59 = vpop.eup %2719 }
0x1679   :  { %1324 = vrot.lane.b32.xlu1 %v2720_v59, %s2793_s4  ;;  %v1212_v59 = vpop.f32.mrf.mxu1 }
0x167a   :  { %v2722_v61 = vpop.eup %2721  ;;  %v1213_v3 = vadd.f32 %v3214_v51, %v1212_v59 }
0x167b   :  { %v1318_v62 = vadd.f32 1.0, %v2722_v61 }
0x167d   :  { %2723 = vrcp.f32 %v1318_v62 }
0x167e   :  { %2725 = vpow2.f32 %v1090_v6 }
0x167f   :  { %2727 = vpow2.f32 %v1094_v8 }
0x168a   :  { %v2724_v12 = vpop.eup %2723 }
0x168b   :  { %v2726_v15 = vpop.eup %2725  ;;  %v1322_v34 = vmul.f32 0.0, %v2724_v12 }
0x168c   :  { %v2728_v63 = vpop.eup %2727 }
0x16eb   :  { %v1325_v9 = vpop.permute.xlu1 %1324 }
0x16ec   :  { %v1327_v10 = vmul.f32 %v2724_v12, %v1325_v9 }
0x16ee   :  { %1329 = vrot.lane.b32.xlu0 %v1327_v10, %s2794_s28 }
0x16f2   :  { %1114 = vrot.lane.b32.xlu0 %v2726_v15, %s2795_s6 }
0x16f6   :  { %1118 = vrot.lane.b32.xlu0 %v2728_v63, %s2795_s6 }
0x1760   :  { %v1330_v14 = vpop.permute.xlu0 %1329 }
0x1761   :  { %v3236_v16 = vadd.f32 %v1330_v14, %v1322_v34 }
0x1763   :  { %2729 = vtanh.f32 %v3236_v16 }
0x1764   :  { %2731 = vpow2.f32 %v1092_v22  ;;  %v1115_v32 = vpop.permute.xlu0 %1114 }
0x1765   :  { %2733 = vpow2.f32 %v1096_v25  ;;  %v1134_v27 = vmul.f32 %v1115_v32, %v1070_v33 }
0x1767   :  { %v3260_v23 = vadd.f32 %v1134_v27, %v3219_v29 }
0x1768   :  { %v1119_v40 = vpop.permute.xlu0 %1118 }
0x1769   :  { %v1136_v45 = vmul.f32 %v1119_v40, %v1072_v38 }
0x176b   :  { %v3268_v54 = vadd.f32 %v1136_v45, %v3222_v0 }
0x1770   :  { %v2730_v28 = vpop.eup %2729 }
0x1771   :  { %1335 = vrot.lane.b32.xlu1 %v2730_v28, %s2793_s4  ;;  %v2732_v30 = vpop.eup %2731 }
0x1772   :  { %v2734_v52 = vpop.eup %2733 }
0x1775   :  { %1116 = vrot.lane.b32.xlu1 %v2732_v30, %s2795_s6 }
0x1779   :  { %1120 = vrot.lane.b32.xlu1 %v2734_v52, %s2795_s6 }
0x17e3   :  { %v1336_v35 = vpop.permute.xlu1 %1335 }
0x17e4   :  { %v3246_v36 = vmul.f32 %v2724_v12, %v1336_v35 }
0x17e6   :  { %1340 = vrot.lane.b32.xlu0 %v3246_v36, %s2794_s28 }
0x17e7   :  { %v1117_v42 = vpop.permute.xlu1 %1116 }
0x17e8   :  { %v1135_v43 = vmul.f32 %v1117_v42, %v1071_v37 }
0x17ea   :  { %v3263_v48 = vadd.f32 %v1135_v43, %v3230_v11 }
0x17eb   :  { %v1121_v49 = vpop.permute.xlu1 %1120 }
0x17ec   :  { %v1148_v26 = vpack.c.bf16 %v3263_v48, %v3260_v23  ;;  %v1137_v46 = vmul.f32 %v1121_v49, %v1073_v50 }
0x17ee   :  { %v3271_v55 = vadd.f32 %v1137_v46, %v3233_v17  ;;  %2530 = vmatprep.mubr.msk.bf16.mxu1 %vm1158_vm4, %v1148_v26 }
0x17f0   :  { %v1149_v56 = vpack.c.bf16 %v3271_v55, %v3268_v54 }
0x17f2   :  { %2531 = vmatmul.mubr.msk.bf16.gmra.mxu1 %vm1158_vm4, %v1149_v56 }
0x17f3   :  { %2553 = vmatprep.mubr.msk.f32.mxu1 %vm2792_vm0, %v2791_v1 }
0x1858   :  { %v1341_v57 = vpop.permute.xlu0 %1340 }
0x1859   :  { %2554 = vmatmul.mubr.msk.f32.vlgmr.msra.gmra.mxu1 %vm151_vm2, %v1341_v57 }
0x185a   :  { %2568 = vmatpush3.msra.mxu1 %v3128_v18  ;;  %2575 = vmatprep.mubr.msk.f32.mxu1 %vm2792_vm0, %v2791_v1 }
0x185b   :  { %2569 = vmatprep.subr.mxu1 %v2791_v1 }
0x185c   :  { %2570 = vmatpush3.msra.mxu1 %v3133_v19 }
0x185d   :  { %2571 = vmatprep.subr.mxu1 %v2791_v1 }
0x185e   :  { %2572 = vmatpush3.msra.mxu1 %v3144_v24 }
0x185f   :  { %2573 = vmatprep.subr.mxu1 %v2791_v1 }
0x1860   :  { %2574 = vmatpush3.msra.mxu1 %v3149_v20 }
0x1861   :  { %2589 = vmatprep.subr.mxu1 %v2791_v1 }
0x18b2   :  { %v3292_v60 = vpop.f32.mrf.mxu1 }
0x18b4   :  { %v3294_v61 = vpop.f32.mrf.mxu1 }
0x18b6   :  { %v3296_v62 = vpop.f32.mrf.mxu1 }
0x18b8   :  { %v3298_v2 = vpop.f32.mrf.mxu1 }
0x1919   :  { %v1410_v6 = vpop.f32.mrf.mxu1 }
0x191a   :  { %v1414_v8 = vadd.f32 %v1410_v6, %v1213_v3  ;;  %v1221_v3 = vadd.f32 %v3290_v58, %v3214_v51 }
0x191b   :  { %v2555_v12 = vpop.f32.mrf.mxu1 }
0x191c   :  { %2735 = vtanh.f32 %v1414_v8  ;;  %v2292_v10 = vmul.f32 -1.442695, %v1414_v8 }
0x191e   :  { %2737 = vpow2.f32 %v2292_v10 }
0x1929   :  { %v2736_v9 = vpop.eup %2735 }
0x192a   :  { %1424 = vrot.lane.b32.xlu1 %v2736_v9, %s2793_s4 }
0x192b   :  { %v2738_v15 = vpop.eup %2737 }
0x192c   :  { %v1418_v63 = vadd.f32 1.0, %v2738_v15 }
0x192e   :  { %2739 = vrcp.f32 %v1418_v63 }
0x193b   :  { %v2740_v13 = vpop.eup %2739 }
0x193c   :  { %v1422_v21 = vmul.f32 %v2740_v13, %v3236_v16  ;;  %v1218_v16 = vadd.f32 %v3209_v47, %v3214_v51 }
0x199c   :  { %v1425_v34 = vpop.permute.xlu1 %1424 }
0x199d   :  { %v1427_v14 = vmul.f32 %v2740_v13, %v1425_v34 }
0x199f   :  { %1429 = vrot.lane.b32.xlu0 %v1427_v14, %s2794_s28 }
0x1a11   :  { %v1430_v22 = vpop.permute.xlu0 %1429 }
0x1a12   :  { %v1432_v25 = vadd.f32 %v1430_v22, %v1422_v21 }
0x1a14   :  { %2741 = vtanh.f32 %v1432_v25 }
0x1a21   :  { %v2742_v28 = vpop.eup %2741 }
0x1a22   :  { %1435 = vrot.lane.b32.xlu1 %v2742_v28, %s2793_s4 }
0x1a94   :  { %v1436_v30 = vpop.permute.xlu1 %1435 }
0x1a95   :  { %v3305_v52 = vmul.f32 %v2740_v13, %v1436_v30 }
0x1a97   :  { %1440 = vrot.lane.b32.xlu0 %v3305_v52, %s2794_s28 }
0x1b09   :  { %v1441_v32 = vpop.permute.xlu0 %1440 }
0x1b0a   :  { %2565 = vmatmul.mubr.msk.f32.vlgmr.msra.gmra.mxu0 %vm151_vm2, %v1441_v32 }
0x1b0b   :  { %2579 = vmatpush3.msra.mxu0 %v3128_v18  ;;  %2586 = vmatprep.mubr.msk.f32.mxu0 %vm2792_vm0, %v2791_v1 }
0x1b0c   :  { %2580 = vmatprep.subr.mxu0 %v2791_v1 }
0x1b0d   :  { %2581 = vmatpush3.msra.mxu0 %v3133_v19 }
0x1b0e   :  { %2582 = vmatprep.subr.mxu0 %v2791_v1 }
0x1b0f   :  { %2583 = vmatpush3.msra.mxu0 %v3144_v24 }
0x1b10   :  { %2584 = vmatprep.subr.mxu0 %v2791_v1 }
0x1b11   :  { %2585 = vmatpush3.msra.mxu0 %v3149_v20 }
0x1b12   :  { %2600 = vmatprep.subr.mxu0 %v2791_v1 }
0x1bca   :  { %v1510_v33 = vpop.f32.mrf.mxu0 }
0x1bcb   :  { %v1514_v35 = vadd.f32 %v1510_v33, %v1218_v16  ;;  %v1226_v16 = vadd.f32 %v3214_v51, %v3294_v61 }
0x1bcc   :  { %v2566_v37 = vpop.f32.mrf.mxu0 }
0x1bcd   :  { %2743 = vtanh.f32 %v1514_v35  ;;  %v2294_v38 = vmul.f32 -1.442695, %v1514_v35 }
0x1bcf   :  { %2745 = vpow2.f32 %v2294_v38 }
0x1bda   :  { %v2744_v27 = vpop.eup %2743 }
0x1bdb   :  { %1524 = vrot.lane.b32.xlu1 %v2744_v27, %s2793_s4 }
0x1bdc   :  { %v2746_v40 = vpop.eup %2745 }
0x1bdd   :  { %v1518_v42 = vadd.f32 1.0, %v2746_v40 }
0x1bdf   :  { %2747 = vrcp.f32 %v1518_v42 }
0x1bec   :  { %v2748_v43 = vpop.eup %2747 }
0x1bed   :  { %v1522_v49 = vmul.f32 %v2748_v43, %v1432_v25 }
0x1c4d   :  { %v1525_v50 = vpop.permute.xlu1 %1524 }
0x1c4e   :  { %v1527_v45 = vmul.f32 %v2748_v43, %v1525_v50 }
0x1c50   :  { %1529 = vrot.lane.b32.xlu0 %v1527_v45, %s2794_s28 }
0x1cc2   :  { %v1530_v26 = vpop.permute.xlu0 %1529 }
0x1cc3   :  { %v1532_v47 = vadd.f32 %v1530_v26, %v1522_v49 }
0x1cc5   :  { %2749 = vtanh.f32 %v1532_v47 }
0x1cd2   :  { %v2750_v46 = vpop.eup %2749 }
0x1cd3   :  { %1535 = vrot.lane.b32.xlu1 %v2750_v46, %s2793_s4 }
0x1d45   :  { %v1536_v56 = vpop.permute.xlu1 %1535 }
0x1d46   :  { %v3325_v57 = vmul.f32 %v2748_v43, %v1536_v56 }
0x1d48   :  { %1540 = vrot.lane.b32.xlu0 %v3325_v57, %s2794_s28 }
0x1dba   :  { %v1541_v59 = vpop.permute.xlu0 %1540 }
0x1dbb   :  { %2576 = vmatmul.mubr.msk.f32.vlgmr.msra.gmra.mxu1 %vm151_vm2, %v1541_v59 }
0x1dbc   :  { %2590 = vmatpush3.msra.mxu1 %v3128_v18  ;;  %2597 = vmatprep.mubr.msk.f32.mxu1 %vm2792_vm0, %v2791_v1 }
0x1dbd   :  { %2591 = vmatprep.subr.mxu1 %v2791_v1 }
0x1dbe   :  { %2592 = vmatpush3.msra.mxu1 %v3133_v19 }
0x1dbf   :  { %2593 = vmatprep.subr.mxu1 %v2791_v1 }
0x1dc0   :  { %2594 = vmatpush3.msra.mxu1 %v3144_v24 }
0x1dc1   :  { %2595 = vmatprep.subr.mxu1 %v2791_v1 }
0x1dc2   :  { %2596 = vmatpush3.msra.mxu1 %v3149_v20 }
0x1dc3   :  { %2611 = vmatprep.subr.mxu1 %v2791_v1 }
0x1e7b   :  { %v1610_v6 = vpop.f32.mrf.mxu1 }
0x1e7c   :  { %v1614_v8 = vadd.f32 %v1610_v6, %v1221_v3  ;;  %v1229_v3 = vadd.f32 %v3214_v51, %v3298_v2 }
0x1e7d   :  { %v2577_v12 = vpop.f32.mrf.mxu1 }
0x1e7e   :  { %2751 = vtanh.f32 %v1614_v8  ;;  %v2296_v10 = vmul.f32 -1.442695, %v1614_v8 }
0x1e80   :  { %2753 = vpow2.f32 %v2296_v10 }
0x1e8b   :  { %v2752_v9 = vpop.eup %2751 }
0x1e8c   :  { %1624 = vrot.lane.b32.xlu1 %v2752_v9, %s2793_s4 }
0x1e8d   :  { %v2754_v15 = vpop.eup %2753 }
0x1e8e   :  { %v1618_v63 = vadd.f32 1.0, %v2754_v15 }
0x1e90   :  { %2755 = vrcp.f32 %v1618_v63 }
0x1e9d   :  { %v2756_v13 = vpop.eup %2755 }
0x1e9e   :  { %v1622_v21 = vmul.f32 %v2756_v13, %v1532_v47 }
0x1efe   :  { %v1625_v34 = vpop.permute.xlu1 %1624 }
0x1eff   :  { %v1627_v14 = vmul.f32 %v2756_v13, %v1625_v34 }
0x1f01   :  { %1629 = vrot.lane.b32.xlu0 %v1627_v14, %s2794_s28 }
0x1f73   :  { %v1630_v22 = vpop.permute.xlu0 %1629 }
0x1f74   :  { %v1632_v58 = vadd.f32 %v1630_v22, %v1622_v21  ;;  %v1234_v22 = vadd.f32 %v3292_v60, %v3214_v51 }
0x1f76   :  { %2757 = vtanh.f32 %v1632_v58 }
0x1f83   :  { %v2758_v25 = vpop.eup %2757 }
0x1f84   :  { %1635 = vrot.lane.b32.xlu1 %v2758_v25, %s2793_s4 }
0x1ff6   :  { %v1636_v28 = vpop.permute.xlu1 %1635 }
0x1ff7   :  { %v3345_v30 = vmul.f32 %v2756_v13, %v1636_v28 }
0x1ff9   :  { %1640 = vrot.lane.b32.xlu0 %v3345_v30, %s2794_s28 }
0x206b   :  { %v1641_v32 = vpop.permute.xlu0 %1640 }
0x206c   :  { %2587 = vmatmul.mubr.msk.f32.vlgmr.msra.gmra.mxu0 %vm151_vm2, %v1641_v32 }
0x206d   :  { %2601 = vmatpush3.msra.mxu0 %v3128_v18  ;;  %2608 = vmatprep.mubr.msk.f32.mxu0 %vm2792_vm0, %v2791_v1 }
0x206e   :  { %2602 = vmatprep.subr.mxu0 %v2791_v1 }
0x206f   :  { %2603 = vmatpush3.msra.mxu0 %v3133_v19 }
0x2070   :  { %2604 = vmatprep.subr.mxu0 %v2791_v1 }
0x2071   :  { %2605 = vmatpush3.msra.mxu0 %v3144_v24 }
0x2072   :  { %2606 = vmatprep.subr.mxu0 %v2791_v1 }
0x2073   :  { %2607 = vmatpush3.msra.mxu0 %v3149_v20 }
0x212c   :  { %v1710_v33 = vpop.f32.mrf.mxu0 }
0x212d   :  { %v1714_v35 = vadd.f32 %v1710_v33, %v1226_v16 }
0x212e   :  { %v2588_v37 = vpop.f32.mrf.mxu0 }
0x212f   :  { %2759 = vtanh.f32 %v1714_v35  ;;  %v2298_v38 = vmul.f32 -1.442695, %v1714_v35 }
0x2131   :  { %2761 = vpow2.f32 %v2298_v38 }
0x213c   :  { %v2760_v27 = vpop.eup %2759 }
0x213d   :  { %1724 = vrot.lane.b32.xlu1 %v2760_v27, %s2793_s4 }
0x213e   :  { %v2762_v40 = vpop.eup %2761 }
0x213f   :  { %v1718_v42 = vadd.f32 1.0, %v2762_v40 }
0x2141   :  { %2763 = vrcp.f32 %v1718_v42 }
0x214e   :  { %v2764_v43 = vpop.eup %2763 }
0x214f   :  { %v1722_v49 = vmul.f32 %v2764_v43, %v1632_v58 }
0x21af   :  { %v1725_v50 = vpop.permute.xlu1 %1724 }
0x21b0   :  { %v1727_v45 = vmul.f32 %v2764_v43, %v1725_v50 }
0x21b2   :  { %1729 = vrot.lane.b32.xlu0 %v1727_v45, %s2794_s28 }
0x2224   :  { %v1730_v26 = vpop.permute.xlu0 %1729 }
0x2225   :  { %v1732_v61 = vadd.f32 %v1730_v26, %v1722_v49  ;;  %v1237_v26 = vadd.f32 %v3296_v62, %v3214_v51  ;;  %v2039_v51 = vpack.c.bf16 %v3305_v52, %v3246_v36  ;;  %v2645_v36 = vld [vmem:[%s3517_s10 + $0x8] sm:$0xff]  }
0x2226   :  { %2622 = vmatprep.subr.bf16.mxu0 %v2645_v36 }
0x2227   :  { %2765 = vtanh.f32 %v1732_v61 }
0x2234   :  { %v2766_v47 = vpop.eup %2765 }
0x2235   :  { %1735 = vrot.lane.b32.xlu1 %v2766_v47, %s2793_s4 }
0x22a7   :  { %v1736_v46 = vpop.permute.xlu1 %1735 }
0x22a8   :  { %v3364_v56 = vmul.f32 %v2764_v43, %v1736_v46 }
0x22aa   :  { %1740 = vrot.lane.b32.xlu0 %v3364_v56, %s2794_s28 }
0x231c   :  { %v1741_v59 = vpop.permute.xlu0 %1740 }
0x231d   :  { %2598 = vmatmul.mubr.msk.f32.vlgmr.msra.gmra.mxu1 %vm151_vm2, %v1741_v59 }
0x231e   :  { %2612 = vmatpush3.msra.mxu1 %v3128_v18  ;;  %2619 = vmatprep.mubr.msk.f32.mxu1 %vm2792_vm0, %v2791_v1 }
0x231f   :  { %2613 = vmatprep.subr.mxu1 %v2791_v1 }
0x2320   :  { %2614 = vmatpush3.msra.mxu1 %v3133_v19 }
0x2321   :  { %2615 = vmatprep.subr.mxu1 %v2791_v1 }
0x2322   :  { %2616 = vmatpush3.msra.mxu1 %v3144_v24 }
0x2323   :  { %2617 = vmatprep.subr.mxu1 %v2791_v1 }
0x2324   :  { %2618 = vmatpush3.msra.mxu1 %v3149_v20 }
0x23dd   :  { %v1810_v6 = vpop.f32.mrf.mxu1 }
0x23de   :  { %v1814_v18 = vadd.f32 %v1810_v6, %v1229_v3 }
0x23df   :  { %v2599_v8 = vpop.f32.mrf.mxu1 }
0x23e0   :  { %2767 = vtanh.f32 %v1814_v18  ;;  %v2300_v9 = vmul.f32 -1.442695, %v1814_v18 }
0x23e2   :  { %2769 = vpow2.f32 %v2300_v9 }
0x23ed   :  { %v2768_v12 = vpop.eup %2767 }
0x23ee   :  { %1824 = vrot.lane.b32.xlu1 %v2768_v12, %s2793_s4 }
0x23ef   :  { %v2770_v19 = vpop.eup %2769 }
0x23f0   :  { %v1818_v10 = vadd.f32 1.0, %v2770_v19 }
0x23f2   :  { %2771 = vrcp.f32 %v1818_v10 }
0x23ff   :  { %v2772_v24 = vpop.eup %2771 }
0x2400   :  { %v1822_v20 = vmul.f32 %v2772_v24, %v1732_v61 }
0x2460   :  { %v1825_v15 = vpop.permute.xlu1 %1824 }
0x2461   :  { %v1827_v1 = vmul.f32 %v2772_v24, %v1825_v15 }
0x2463   :  { %1829 = vrot.lane.b32.xlu0 %v1827_v1, %s2794_s28 }
0x24d5   :  { %v1830_v63 = vpop.permute.xlu0 %1829 }
0x24d6   :  { %v1832_v2 = vadd.f32 %v1830_v63, %v1822_v20 }
0x24d8   :  { %2773 = vtanh.f32 %v1832_v2 }
0x24e5   :  { %v2774_v13 = vpop.eup %2773 }
0x24e6   :  { %1835 = vrot.lane.b32.xlu1 %v2774_v13, %s2793_s4 }
0x2558   :  { %v1836_v34 = vpop.permute.xlu1 %1835 }
0x2559   :  { %v1838_v14 = vmul.f32 %v2772_v24, %v1836_v34 }
0x255b   :  { %1840 = vrot.lane.b32.xlu0 %v1838_v14, %s2794_s28  ;;  %v2041_v62 = vpack.c.bf16 %v1838_v14, %v3364_v56 }
0x25cd   :  { %v1841_v21 = vpop.permute.xlu0 %1840 }
0x25ce   :  { %2609 = vmatmul.mubr.msk.f32.vlgmr.msra.gmra.mxu0 %vm151_vm2, %v1841_v21 }
0x25cf   :  { %2623 = vmatpush3.bf16.msra.mxu0 %v2645_v36 }
0x268e   :  { %v1910_v58 = vpop.f32.mrf.mxu0 }
0x268f   :  { %v1914_v25 = vadd.f32 %v1910_v58, %v1234_v22 }
0x2690   :  { %v2610_v28 = vpop.f32.mrf.mxu0 }
0x2691   :  { %2775 = vtanh.f32 %v1914_v25  ;;  %v2302_v16 = vmul.f32 -1.442695, %v1914_v25 }
0x2693   :  { %2777 = vpow2.f32 %v2302_v16 }
0x269e   :  { %v2776_v32 = vpop.eup %2775 }
0x269f   :  { %1924 = vrot.lane.b32.xlu1 %v2776_v32, %s2793_s4 }
0x26a0   :  { %v2778_v33 = vpop.eup %2777 }
0x26a1   :  { %v1918_v35 = vadd.f32 1.0, %v2778_v33 }
0x26a3   :  { %2779 = vrcp.f32 %v1918_v35 }
0x26b0   :  { %v2780_v37 = vpop.eup %2779 }
0x26b1   :  { %v1922_v40 = vmul.f32 %v2780_v37, %v1832_v2 }
0x2711   :  { %v1925_v27 = vpop.permute.xlu1 %1924 }
0x2712   :  { %v1927_v38 = vmul.f32 %v2780_v37, %v1925_v27 }
0x2714   :  { %1929 = vrot.lane.b32.xlu0 %v1927_v38, %s2794_s28 }
0x2786   :  { %v1930_v42 = vpop.permute.xlu0 %1929 }
0x2787   :  { %v1932_v60 = vadd.f32 %v1930_v42, %v1922_v40 }
0x2789   :  { %2781 = vtanh.f32 %v1932_v60 }
0x2796   :  { %v2782_v43 = vpop.eup %2781 }
0x2797   :  { %1935 = vrot.lane.b32.xlu1 %v2782_v43, %s2793_s4 }
0x2809   :  { %v1936_v50 = vpop.permute.xlu1 %1935 }
0x280a   :  { %v1938_v45 = vmul.f32 %v2780_v37, %v1936_v50 }
0x280c   :  { %1940 = vrot.lane.b32.xlu0 %v1938_v45, %s2794_s28 }
0x287e   :  { %v1941_v49 = vpop.permute.xlu0 %1940 }
0x287f   :  { %2620 = vmatmul.mubr.msk.f32.vlgmr.msra.gmra.mxu1 %vm151_vm2, %v1941_v49 }
0x293f   :  { %v2010_v61 = vpop.f32.mrf.mxu1 }
0x2940   :  { %v2014_v47 = vadd.f32 %v2010_v61, %v1237_v26 }
0x2941   :  { %v2621_v46 = vpop.f32.mrf.mxu1 }
0x2942   :  { %2783 = vtanh.f32 %v2014_v47  ;;  %v2304_v3 = vmul.f32 -1.442695, %v2014_v47 }
0x2944   :  { %2785 = vpow2.f32 %v2304_v3 }
0x294f   :  { %v2784_v59 = vpop.eup %2783 }
0x2950   :  { %2024 = vrot.lane.b32.xlu1 %v2784_v59, %s2793_s4 }
0x2951   :  { %v2786_v6 = vpop.eup %2785 }
0x2952   :  { %v2018_v18 = vadd.f32 1.0, %v2786_v6 }
0x2954   :  { %2787 = vrcp.f32 %v2018_v18 }
0x2961   :  { %v2788_v8 = vpop.eup %2787 }
0x29c2   :  { %v2025_v12 = vpop.permute.xlu1 %2024 }
0x29c3   :  { %v2027_v9 = vmul.f32 %v2788_v8, %v2025_v12 }
0x29c5   :  { %2029 = vrot.lane.b32.xlu0 %v2027_v9, %s2794_s28 }
0x29c9   :  { %2058 = vrot.lane.b32.xlu0 %v2039_v51, %s2794_s28 }
0x29cd   :  { %2062 = vrot.lane.b32.xlu0 %v2041_v62, %s2794_s28 }
0x29d1   :  { %2163 = vrot.lane.b32.xlu0 %v3170_v39, %s2796_s1  ;;  %v2022_v39 = vmul.f32 %v2788_v8, %v1932_v60 }
0x29d5   :  { %2167 = vrot.lane.b32.xlu0 %v3178_v4, %s2796_s1 }
0x29d9   :  { %2171 = vrot.lane.b32.xlu0 %v3260_v23, %s2796_s1 }
0x29dd   :  { %2175 = vrot.lane.b32.xlu0 %v3268_v54, %s2796_s1  ;;  %v2646_v54 = vld [vmem:[%s3517_s10] sm:$0xff]  }
0x29de   :  { %2624 = vmatprep.subr.bf16.mxu0 %v2646_v54 }
0x29df   :  { %2625 = vmatpush3.bf16.msra.mxu0 %v2646_v54 }
0x29e1   :  { %2195 = vrot.lane.b32.xlu0 %v3097_v53, %s2797_s20 }
0x29e5   :  { %2199 = vrot.lane.b32.xlu0 %v3100_v31, %s2797_s20 }
0x29e9   :  { %2203 = vrot.lane.b32.xlu0 %v3219_v29, %s2797_s20  ;;  %v2040_v29 = vpack.c.bf16 %v3345_v30, %v3325_v57 }
0x29ed   :  { %2207 = vrot.lane.b32.xlu0 %v3222_v0, %s2797_s20 }
0x2a37   :  { %v2030_v4 = vpop.permute.xlu0 %2029 }
0x2a38   :  { %v2032_v23 = vadd.f32 %v2030_v4, %v2022_v39 }
0x2a3a   :  { %2789 = vtanh.f32 %v2032_v23 }
0x2a3b   :  { %v2059_v53 = vpop.permute.xlu0 %2058 }
0x2a3c   :  { %2626 = vmatprep.mubr.msk.bf16.mxu0 %vm151_vm2, %v2059_v53 }
0x2a3f   :  { %v2063_v10 = vpop.permute.xlu0 %2062 }
0x2a47   :  { %v2790_v31 = vpop.eup %2789 }
0x2a48   :  { %2035 = vrot.lane.b32.xlu1 %v2790_v31, %s2793_s4 }
0x2a4c   :  { %2060 = vrot.lane.b32.xlu1 %v2040_v29, %s2794_s28 }
0x2aba   :  { %v2036_v0 = vpop.permute.xlu1 %2035 }
0x2abb   :  { %v2038_v52 = vmul.f32 %v2788_v8, %v2036_v0 }
0x2abd   :  { %v2042_v56 = vpack.c.bf16 %v2038_v52, %v1938_v45 }
0x2abe   :  { %v2061_v19 = vpop.permute.xlu1 %2060 }
0x2abf   :  { %2064 = vrot.lane.b32.xlu1 %v2042_v56, %s2794_s28  ;;  %2627 = vmatmul.mubr.msk.bf16.vlgmr.msra.gmra.mxu0 %vm151_vm2, %v2061_v19 }
0x2ac0   :  { %2630 = vmatprep.mubr.msk.bf16.mxu0 %vm151_vm2, %v2063_v10 }
0x2ac3   :  { %2165 = vrot.lane.b32.xlu1 %v3173_v41, %s2796_s1 }
0x2ac7   :  { %2169 = vrot.lane.b32.xlu1 %v3181_v44, %s2796_s1  ;;  %v2164_v44 = vpop.permute.xlu0 %2163 }
0x2acb   :  { %2173 = vrot.lane.b32.xlu1 %v3263_v48, %s2796_s1  ;;  %v2168_v57 = vpop.permute.xlu0 %2167 }
0x2acf   :  { %2177 = vrot.lane.b32.xlu1 %v3271_v55, %s2796_s1  ;;  %v2172_v55 = vpop.permute.xlu0 %2171 }
0x2ad3   :  { %2197 = vrot.lane.b32.xlu1 %v3111_v5, %s2797_s20  ;;  %v2176_v15 = vpop.permute.xlu0 %2175 }
0x2ad7   :  { %2201 = vrot.lane.b32.xlu1 %v3114_v7, %s2797_s20  ;;  %v2196_v1 = vpop.permute.xlu0 %2195  ;;  %v2305_v7 = vld [vmem:[%s3518_s11] ss:$0 sm:$0xff] }
0x2adb   :  { %2205 = vrot.lane.b32.xlu1 %v3230_v11, %s2797_s20  ;;  %v2200_v2 = vpop.permute.xlu0 %2199 }
0x2adf   :  { %2209 = vrot.lane.b32.xlu1 %v3233_v17, %s2797_s20  ;;  %v2204_v43 = vpop.permute.xlu0 %2203 }
0x2ae3   :  { %v2208_v61 = vpop.permute.xlu0 %2207 }
0x2b31   :  { %v2065_v41 = vpop.permute.xlu1 %2064 }
0x2b32   :  { %2631 = vmatmul.mubr.msk.bf16.gmra.mxu0 %vm151_vm2, %v2065_v41 }
0x2b35   :  { %v2166_v48 = vpop.permute.xlu1 %2165 }
0x2b39   :  { %v2170_v30 = vpop.permute.xlu1 %2169 }
0x2b3d   :  { %v2174_v24 = vpop.permute.xlu1 %2173 }
0x2b41   :  { %v2178_v5 = vpop.permute.xlu1 %2177 }
0x2b45   :  { %v2198_v20 = vpop.permute.xlu1 %2197 }
0x2b49   :  { %v2202_v16 = vpop.permute.xlu1 %2201 }
0x2b4d   :  { %v2206_v45 = vpop.permute.xlu1 %2205 }
0x2b51   :  { %v2210_v51 = vpop.permute.xlu1 %2209 }
0x2b7f   :  { %v2628_v11 = vpop.f32.mrf.mxu0 }
0x2b80   :  { %v2133_v63 = vadd.f32 %v2628_v11, %v2305_v7 }
0x2b81   :  { %v2124_v17 = vpop.f32.mrf.mxu0 }
0x2b82   :  { %v2221_v13 = vsel %vm69_vm1, %v2133_v63, %v2168_v57  ;;  %v2125_v34 = vadd.f32 %v2305_v7, %v2124_v17 }
0x2b83   :  { %v2230_v14 = vsel %vm2227_vm5, %v2221_v13, %v2200_v2  ;;  %v2629_v21 = vpop.f32.mrf.mxu0 }
0x2b84   :  { %v2238_v22 = vsel %vm151_vm2, %v2230_v14, %v2200_v2  ;;  %v2219_v58 = vsel %vm69_vm1, %v2125_v34, %v2164_v44  ;;  %v2136_v25 = vadd.f32 %v2629_v21, %v2305_v7 }
0x2b85   :  { %2247 = vst.msk [vmem:[%s3519_s12 + $0x10] sm:$0xff] %vm2244_vm6, %v2238_v22  ;;  %v2228_v28 = vsel %vm2227_vm5, %v2219_v58, %v2196_v1  ;;  %v2127_v32 = vpop.f32.mrf.mxu0 }
0x2b86   :  { %v2236_v33 = vsel %vm151_vm2, %v2228_v28, %v2196_v1  ;;  %v2222_v35 = vsel %vm69_vm1, %v2136_v25, %v2170_v30  ;;  %v2128_v37 = vadd.f32 %v2305_v7, %v2127_v32 }
0x2b87   :  { %2245 = vst.msk [vmem:[%s3519_s12] sm:$0xff] %vm2244_vm6, %v2236_v33  ;;  %v2231_v27 = vsel %vm2227_vm5, %v2222_v35, %v2202_v16 }
0x2b88   :  { %v2239_v38 = vsel %vm151_vm2, %v2231_v27, %v2202_v16  ;;  %v2220_v40 = vsel %vm69_vm1, %v2128_v37, %v2166_v48 }
0x2b89   :  { %2248 = vst.msk [vmem:[%s3519_s12 + $0x18] sm:$0xff] %vm2244_vm6, %v2239_v38  ;;  %v2229_v42 = vsel %vm2227_vm5, %v2220_v40, %v2198_v20 }
0x2b8a   :  { %v2237_v60 = vsel %vm151_vm2, %v2229_v42, %v2198_v20 }
0x2b8b   :  { %2246 = vst.msk [vmem:[%s3519_s12 + $0x8] sm:$0xff] %vm2244_vm6, %v2237_v60 }
0x2bf2   :  { %v2632_v50 = vpop.f32.mrf.mxu0 }
0x2bf3   :  { %v2149_v49 = vadd.f32 %v2632_v50, %v2305_v7 }
0x2bf4   :  { %v2140_v26 = vpop.f32.mrf.mxu0 }
0x2bf5   :  { %v2225_v47 = vsel %vm69_vm1, %v2149_v49, %v2176_v15  ;;  %v2141_v46 = vadd.f32 %v2305_v7, %v2140_v26 }
0x2bf6   :  { %v2234_v59 = vsel %vm2227_vm5, %v2225_v47, %v2208_v61  ;;  %v2633_v3 = vpop.f32.mrf.mxu0 }
0x2bf7   :  { %v2242_v6 = vsel %vm151_vm2, %v2234_v59, %v2208_v61  ;;  %v2223_v18 = vsel %vm69_vm1, %v2141_v46, %v2172_v55  ;;  %v2152_v8 = vadd.f32 %v2633_v3, %v2305_v7 }
0x2bf8   :  { %2251 = vst.msk [vmem:[%s3519_s12 + $0x30] sm:$0xff] %vm2244_vm6, %v2242_v6  ;;  %v2232_v12 = vsel %vm2227_vm5, %v2223_v18, %v2204_v43  ;;  %v2143_v9 = vpop.f32.mrf.mxu0 }
0x2bf9   :  { %v2240_v62 = vsel %vm151_vm2, %v2232_v12, %v2204_v43  ;;  %v2226_v36 = vsel %vm69_vm1, %v2152_v8, %v2178_v5  ;;  %v2144_v39 = vadd.f32 %v2305_v7, %v2143_v9 }
0x2bfa   :  { %2249 = vst.msk [vmem:[%s3519_s12 + $0x20] sm:$0xff] %vm2244_vm6, %v2240_v62  ;;  %v2235_v4 = vsel %vm2227_vm5, %v2226_v36, %v2210_v51 }
0x2bfb   :  { %v2243_v23 = vsel %vm151_vm2, %v2235_v4, %v2210_v51  ;;  %v2224_v54 = vsel %vm69_vm1, %v2144_v39, %v2174_v24 }
0x2bfc   :  { %2252 = vst.msk [vmem:[%s3519_s12 + $0x38] sm:$0xff] %vm2244_vm6, %v2243_v23  ;;  %v2233_v53 = vsel %vm2227_vm5, %v2224_v54, %v2206_v45 }
0x2bfd   :  { %v2241_v31 = vsel %vm151_vm2, %v2233_v53, %v2206_v45 }
0x2bfe   :  { %2250 = vst.msk [vmem:[%s3519_s12 + $0x28] sm:$0xff] %vm2244_vm6, %v2241_v31 }

</bundles_post_ra>
